<compile_context>
chip_gen: v7x
topology: tpu7x:2x2x1
jax: 0.10.0
libtpu: 0.0.40
codegen_flags: <defaults>
</compile_context>

<pallas_src>
import jax
import jax.numpy as jnp
import numpy as np
from jax.experimental import pallas as pl
from jax.experimental.pallas import tpu as pltpu


# --------------------------- fused Learner kernel -----------------------------
def _make_fused_kernel(n_layers, hidden_size, output_size, seq_len, batch_block):
    H, O, T, bb = hidden_size, output_size, seq_len, batch_block

    def kernel(x_ref, *args):
        # args: [w_ih_0, w_hh_0, b_0, ..., w_ih_{L-1}, w_hh_{L-1}, b_{L-1},
        #        lin_w, lin_b, y_ref, gates_scr, hseq_scr]
        layer_refs = args[:3 * n_layers]
        lin_w_ref, lin_b_ref, y_ref, gates_scr, hseq_scr = args[3 * n_layers:]

        din = x_ref.shape[-1]
        # Batch-major (b, t) row order == PyTorch's `.contiguous().view(-1, H)`.
        # Layout-preserving reshape (merge leading dims, lane dim unchanged).
        layer_in = x_ref[...].reshape(bb * T, din)

        for l in range(n_layers):
            w_ih = layer_refs[3 * l][...]        # [in_dim, 4H]  (pre-transposed)
            w_hh = layer_refs[3 * l + 1][...]    # [H, 4H]       (pre-transposed)
            bias = layer_refs[3 * l + 2][...]    # [1, 4H]       (b_ih + b_hh)

            # Hoisted input projection: one big GEMM per layer, result resident
            # in VMEM scratch for the whole recurrence.
            gates_scr[...] = (
                jnp.dot(layer_in, w_ih, preferred_element_type=jnp.float32) + bias
            ).reshape(bb, T, 4 * H)

            h = jnp.zeros((bb, H), jnp.float32)
            c = jnp.zeros((bb, H), jnp.float32)
            # Short, statically-unrolled time loop: all slicing is static, only
            # the tiny h @ W_hh matmul sits on the serial critical path.
            for t in range(T):
                g = gates_scr[:, t, :] + jnp.dot(
                    h, w_hh, preferred_element_type=jnp.float32)   # [bb, 4H]
                sg = jax.nn.sigmoid(g)          # full-vreg sigmoid, slice after
                i_g = sg[:, 0 * H:1 * H]
                f_g = sg[:, 1 * H:2 * H]
                o_g = sg[:, 3 * H:4 * H]
                g_g = jnp.tanh(g[:, 2 * H:3 * H])
                c = f_g * c + i_g * g_g
                h = o_g * jnp.tanh(c)
                hseq_scr[:, t, :] = h
            # Inter-layer activation stays in VMEM (no HBM round trip).
            layer_in = hseq_scr[...].reshape(bb * T, H)

        # Fused final Linear; single store of the whole [bb, T, O] block.
        out = jnp.dot(layer_in, lin_w_ref[...],
                      preferred_element_type=jnp.float32) + lin_b_ref[...]
        y_ref[...] = out.reshape(bb, T, O).astype(y_ref.dtype)

    return kernel


def learner_forward(x, layer_params, lin_w, lin_b, *, hidden_size, output_size,
                    num_batch_blocks=1):
    """x: [B, T, D] batch-first. Returns [B, T, output_size]."""
    B, T, D = x.shape
    H, O = hidden_size, output_size
    n_layers = len(layer_params)

    if num_batch_blocks < 1 or B % num_batch_blocks != 0:
        num_batch_blocks = 1
    bb = B // num_batch_blocks

    kernel = _make_fused_kernel(n_layers, H, O, T, bb)

    flat_params = []
    in_specs = [pl.BlockSpec((bb, T, D), lambda i: (i, 0, 0))]   # batch-sliced x
    for (w_ih, w_hh, b) in layer_params:
        din = w_ih.shape[0]
        # Loop-invariant weights: block index never changes across the grid, so
        # Pallas skips re-DMA between steps.
        in_specs.append(pl.BlockSpec((din, 4 * H), lambda i: (0, 0)))
        in_specs.append(pl.BlockSpec((H, 4 * H), lambda i: (0, 0)))
        in_specs.append(pl.BlockSpec((1, 4 * H), lambda i: (0, 0)))
        flat_params += [w_ih, w_hh, b]
    in_specs.append(pl.BlockSpec((H, O), lambda i: (0, 0)))
    in_specs.append(pl.BlockSpec((1, O), lambda i: (0, 0)))

    return pl.pallas_call(
        kernel,
        out_shape=jax.ShapeDtypeStruct((B, T, O), jnp.float32),
        grid_spec=pltpu.PrefetchScalarGridSpec(
            num_scalar_prefetch=0,
            grid=(num_batch_blocks,),            # independent sequences
            in_specs=in_specs,
            out_specs=pl.BlockSpec((bb, T, O), lambda i: (i, 0, 0)),
            scratch_shapes=[
                pltpu.VMEM((bb, T, 4 * H), jnp.float32),   # hoisted gate proj
                pltpu.VMEM((bb, T, H), jnp.float32),       # layer output h_t
            ],
        ),
        compiler_params=pltpu.CompilerParams(
            dimension_semantics=("parallel",),   # batch axis: megacore-shardable
            vmem_limit_bytes=32 * 1024 * 1024,
        ),
    )(x, *flat_params, lin_w, lin_b)


# ------------------------------ Learner wrapper -------------------------------
class LearnerPallas:
    """Config ('LSTM', [input_size, hidden_size, n_layers, output_size, dropout])."""

    def __init__(self, config, key):
        (name, param), = config
        assert name == "LSTM"
        (self.input_size, self.hidden_size, self.n_layers,
         self.output_size, self.dropout_rate) = param

        H, D, O = self.hidden_size, self.input_size, self.output_size
        k = 1.0 / np.sqrt(H)
        self.layer_params = []
        for layer in range(self.n_layers):
            in_dim = D if layer == 0 else H
            key, k1, k2, k3, k4 = jax.random.split(key, 5)
            # Stored pre-transposed: W_ih^T [in_dim, 4H], W_hh^T [H, 4H].
            w_ih = jax.random.uniform(k1, (in_dim, 4 * H), jnp.float32, -k, k)
            w_hh = jax.random.uniform(k2, (H, 4 * H), jnp.float32, -k, k)
            b_ih = jax.random.uniform(k3, (4 * H,), jnp.float32, -k, k)
            b_hh = jax.random.uniform(k4, (4 * H,), jnp.float32, -k, k)
            self.layer_params.append((w_ih, w_hh, (b_ih + b_hh).reshape(1, 4 * H)))

        key, k5, k6 = jax.random.split(key, 3)
        self.lin_w = jax.random.uniform(k5, (H, O), jnp.float32, -k, k)   # W^T
        self.lin_b = jax.random.uniform(k6, (O,), jnp.float32, -k, k).reshape(1, O)

    def __call__(self, x, num_batch_blocks=1):
        # x: [setsz, seq, input_size] (batch_first, matches PyTorch)
        return learner_forward(
            x, self.layer_params, self.lin_w, self.lin_b,
            hidden_size=self.hidden_size, output_size=self.output_size,
            num_batch_blocks=num_batch_blocks)


# ------------------------------ pure-JAX reference ----------------------------
def _reference(x, layer_params, lin_w, lin_b, hidden_size, output_size):
    B = x.shape[0]
    H = hidden_size
    h_seq = jnp.transpose(x, (1, 0, 2))   # [T, B, D]
    for (w_ih, w_hh, b) in layer_params:
        def step(carry, x_t):
            h, c = carry
            g = x_t @ w_ih + h @ w_hh + b[0]
            i = jax.nn.sigmoid(g[:, 0 * H:1 * H])
            f = jax.nn.sigmoid(g[:, 1 * H:2 * H])
            gg = jnp.tanh(g[:, 2 * H:3 * H])
            o = jax.nn.sigmoid(g[:, 3 * H:4 * H])
            c = f * c + i * gg
            h = o * jnp.tanh(c)
            return (h, c), h

        init = (jnp.zeros((B, H), jnp.float32), jnp.zeros((B, H), jnp.float32))
        _, h_seq = jax.lax.scan(step, init, h_seq)
    out = jnp.transpose(h_seq, (1, 0, 2)).reshape(-1, H) @ lin_w + lin_b[0]
    return out.reshape(B, -1, output_size)


if __name__ == "__main__":
    # config: [input_size, hidden_size, n_layers, output_size, dropout_rate]
    config = [("LSTM", [16, 32, 2, 8, 0.0])]

    key = jax.random.PRNGKey(0)
    key, k_x, k_p = jax.random.split(key, 3)

    setsz, seq, input_size = 2, 8, 16
    x = jax.random.normal(k_x, (setsz, seq, input_size), jnp.float32)

    model = LearnerPallas(config, k_p)

    out = jax.block_until_ready(model(x))                       # single block
    ref = _reference(x, model.layer_params, model.lin_w, model.lin_b,
                     model.hidden_size, model.output_size)
    np.testing.assert_allclose(np.asarray(out), np.asarray(ref),
                               rtol=1e-4, atol=1e-4)
    assert out.shape == (setsz, seq, model.output_size)

    # Also exercise the batch-parallel grid path (2 blocks -> 2 TCs on v7x).
    out2 = jax.block_until_ready(model(x, num_batch_blocks=2))
    np.testing.assert_allclose(np.asarray(out2), np.asarray(ref),
                               rtol=1e-4, atol=1e-4)

    print("KERNEL_OK")
</pallas_src>

<mosaic_0001>
module attributes {stable_mosaic.version = 11 : i64} {
  func.func @kernel(%arg0: i32, %arg1: memref<2x8x16xf32, #tpu.memory_space<vmem>>, %arg2: memref<16x128xf32, #tpu.memory_space<vmem>>, %arg3: memref<32x128xf32, #tpu.memory_space<vmem>>, %arg4: memref<1x128xf32, #tpu.memory_space<vmem>>, %arg5: memref<32x128xf32, #tpu.memory_space<vmem>>, %arg6: memref<32x128xf32, #tpu.memory_space<vmem>>, %arg7: memref<1x128xf32, #tpu.memory_space<vmem>>, %arg8: memref<32x8xf32, #tpu.memory_space<vmem>>, %arg9: memref<1x8xf32, #tpu.memory_space<vmem>>, %arg10: memref<2x8x8xf32, #tpu.memory_space<vmem>>, %arg11: memref<2x8x128xf32, #tpu.memory_space<vmem>>, %arg12: memref<2x8x32xf32, #tpu.memory_space<vmem>>) attributes {dimension_semantics = [#tpu.dimension_semantics<parallel>], iteration_bounds = array<i64: 1>, scalar_prefetch = 0 : i64, scratch_operands = 2 : i64, tpu.core_type = #tpu.core_type<tc>, window_params = [{transform_indices = @transform_0, window_bounds = array<i64: 2, 8, 16>}, {pipeline_mode = #tpu.pipeline_mode<synchronous>, transform_indices = @transform_1, window_bounds = array<i64: 16, 128>}, {pipeline_mode = #tpu.pipeline_mode<synchronous>, transform_indices = @transform_2, window_bounds = array<i64: 32, 128>}, {pipeline_mode = #tpu.pipeline_mode<synchronous>, transform_indices = @transform_3, window_bounds = array<i64: 1, 128>}, {pipeline_mode = #tpu.pipeline_mode<synchronous>, transform_indices = @transform_4, window_bounds = array<i64: 32, 128>}, {pipeline_mode = #tpu.pipeline_mode<synchronous>, transform_indices = @transform_5, window_bounds = array<i64: 32, 128>}, {pipeline_mode = #tpu.pipeline_mode<synchronous>, transform_indices = @transform_6, window_bounds = array<i64: 1, 128>}, {pipeline_mode = #tpu.pipeline_mode<synchronous>, transform_indices = @transform_7, window_bounds = array<i64: 32, 8>}, {pipeline_mode = #tpu.pipeline_mode<synchronous>, transform_indices = @transform_8, window_bounds = array<i64: 1, 8>}, {transform_indices = @transform_9, window_bounds = array<i64: 2, 8, 8>}]} {
    %c0 = arith.constant 0 : index
    %c0_0 = arith.constant 0 : index
    %c0_1 = arith.constant 0 : index
    %0 = vector.load %arg1[%c0, %c0_0, %c0_1] : memref<2x8x16xf32, #tpu.memory_space<vmem>>, vector<2x8x16xf32>
    %1 = vector.shape_cast %0 : vector<2x8x16xf32> to vector<16x16xf32>
    %c0_2 = arith.constant 0 : index
    %c0_3 = arith.constant 0 : index
    %2 = vector.load %arg2[%c0_2, %c0_3] : memref<16x128xf32, #tpu.memory_space<vmem>>, vector<16x128xf32>
    %c0_4 = arith.constant 0 : index
    %c0_5 = arith.constant 0 : index
    %3 = vector.load %arg3[%c0_4, %c0_5] : memref<32x128xf32, #tpu.memory_space<vmem>>, vector<32x128xf32>
    %c0_6 = arith.constant 0 : index
    %c0_7 = arith.constant 0 : index
    %4 = vector.load %arg4[%c0_6, %c0_7] : memref<1x128xf32, #tpu.memory_space<vmem>>, vector<1x128xf32>
    %cst = arith.constant dense<0.000000e+00> : vector<16x128xf32>
    %5 = tpu.matmul %1, %2, %cst {dimension_numbers = #tpu.dot_dimension_numbers<[1], [0], [0], [1], [0, 0, 1, 1], [], []>} : vector<16x16xf32>, vector<16x128xf32>, vector<16x128xf32> -> vector<16x128xf32>
    %6 = vector.broadcast %4 : vector<1x128xf32> to vector<16x128xf32>
    %7 = arith.addf %5, %6 : vector<16x128xf32>
    %8 = vector.shape_cast %7 : vector<16x128xf32> to vector<2x8x128xf32>
    %c0_8 = arith.constant 0 : index
    %c0_9 = arith.constant 0 : index
    %c0_10 = arith.constant 0 : index
    %9 = vector.load %arg11[%c0_8, %c0_9, %c0_10] : memref<2x8x128xf32, #tpu.memory_space<vmem>>, vector<2x8x128xf32>
    tpu.vector_store %arg11[%c0_8, %c0_9, %c0_10], %8 {strides = array<i32>} : memref<2x8x128xf32, #tpu.memory_space<vmem>>, vector<2x8x128xf32>,
    %cst_11 = arith.constant 0.000000e+00 : f32
    %10 = vector.broadcast %cst_11 : f32 to vector<2x32xf32>
    %cst_12 = arith.constant 0.000000e+00 : f32
    %11 = vector.broadcast %cst_12 : f32 to vector<2x32xf32>
    %c0_13 = arith.constant 0 : index
    %c0_14 = arith.constant 0 : index
    %c0_15 = arith.constant 0 : index
    %12 = vector.load %arg11[%c0_13, %c0_14, %c0_15] : memref<2x8x128xf32, #tpu.memory_space<vmem>>, vector<2x1x128xf32>
    %13 = vector.shape_cast %12 : vector<2x1x128xf32> to vector<2x128xf32>
    %cst_16 = arith.constant dense<0.000000e+00> : vector<2x128xf32>
    %14 = tpu.matmul %10, %3, %cst_16 {dimension_numbers = #tpu.dot_dimension_numbers<[1], [0], [0], [1], [0, 0, 1, 1], [], []>} : vector<2x32xf32>, vector<32x128xf32>, vector<2x128xf32> -> vector<2x128xf32>
    %15 = arith.addf %13, %14 : vector<2x128xf32>
    %16 = arith.negf %15 : vector<2x128xf32>
    %17 = math.exp %16 : vector<2x128xf32>
    %cst_17 = arith.constant 1.000000e+00 : f32
    %18 = vector.broadcast %cst_17 : f32 to vector<2x128xf32>
    %19 = arith.addf %18, %17 : vector<2x128xf32>
    %20 = arith.divf %18, %19 : vector<2x128xf32>
    %21 = vector.extract_strided_slice %20 {offsets = [0, 0], sizes = [2, 32], strides = [1, 1]} : vector<2x128xf32> to vector<2x32xf32>
    %22 = vector.extract_strided_slice %20 {offsets = [0, 32], sizes = [2, 32], strides = [1, 1]} : vector<2x128xf32> to vector<2x32xf32>
    %23 = vector.extract_strided_slice %20 {offsets = [0, 96], sizes = [2, 32], strides = [1, 1]} : vector<2x128xf32> to vector<2x32xf32>
    %24 = vector.extract_strided_slice %15 {offsets = [0, 64], sizes = [2, 32], strides = [1, 1]} : vector<2x128xf32> to vector<2x32xf32>
    %25 = math.tanh %24 : vector<2x32xf32>
    %26 = arith.mulf %22, %11 : vector<2x32xf32>
    %27 = arith.mulf %21, %25 : vector<2x32xf32>
    %28 = arith.addf %26, %27 : vector<2x32xf32>
    %29 = math.tanh %28 : vector<2x32xf32>
    %30 = arith.mulf %23, %29 : vector<2x32xf32>
    %c0_18 = arith.constant 0 : index
    %c0_19 = arith.constant 0 : index
    %c0_20 = arith.constant 0 : index
    %31 = vector.load %arg12[%c0_18, %c0_19, %c0_20] : memref<2x8x32xf32, #tpu.memory_space<vmem>>, vector<2x1x32xf32>
    %32 = vector.shape_cast %31 : vector<2x1x32xf32> to vector<2x32xf32>
    %33 = vector.shape_cast %30 : vector<2x32xf32> to vector<2x1x32xf32>
    tpu.vector_store %arg12[%c0_18, %c0_19, %c0_20], %33 {strides = array<i32>} : memref<2x8x32xf32, #tpu.memory_space<vmem>>, vector<2x1x32xf32>,
    %c0_21 = arith.constant 0 : index
    %c1 = arith.constant 1 : index
    %c0_22 = arith.constant 0 : index
    %34 = vector.load %arg11[%c0_21, %c1, %c0_22] : memref<2x8x128xf32, #tpu.memory_space<vmem>>, vector<2x1x128xf32>
    %35 = vector.shape_cast %34 : vector<2x1x128xf32> to vector<2x128xf32>
    %cst_23 = arith.constant dense<0.000000e+00> : vector<2x128xf32>
    %36 = tpu.matmul %30, %3, %cst_23 {dimension_numbers = #tpu.dot_dimension_numbers<[1], [0], [0], [1], [0, 0, 1, 1], [], []>} : vector<2x32xf32>, vector<32x128xf32>, vector<2x128xf32> -> vector<2x128xf32>
    %37 = arith.addf %35, %36 : vector<2x128xf32>
    %38 = arith.negf %37 : vector<2x128xf32>
    %39 = math.exp %38 : vector<2x128xf32>
    %cst_24 = arith.constant 1.000000e+00 : f32
    %40 = vector.broadcast %cst_24 : f32 to vector<2x128xf32>
    %41 = arith.addf %40, %39 : vector<2x128xf32>
    %42 = arith.divf %40, %41 : vector<2x128xf32>
    %43 = vector.extract_strided_slice %42 {offsets = [0, 0], sizes = [2, 32], strides = [1, 1]} : vector<2x128xf32> to vector<2x32xf32>
    %44 = vector.extract_strided_slice %42 {offsets = [0, 32], sizes = [2, 32], strides = [1, 1]} : vector<2x128xf32> to vector<2x32xf32>
    %45 = vector.extract_strided_slice %42 {offsets = [0, 96], sizes = [2, 32], strides = [1, 1]} : vector<2x128xf32> to vector<2x32xf32>
    %46 = vector.extract_strided_slice %37 {offsets = [0, 64], sizes = [2, 32], strides = [1, 1]} : vector<2x128xf32> to vector<2x32xf32>
    %47 = math.tanh %46 : vector<2x32xf32>
    %48 = arith.mulf %44, %28 : vector<2x32xf32>
    %49 = arith.mulf %43, %47 : vector<2x32xf32>
    %50 = arith.addf %48, %49 : vector<2x32xf32>
    %51 = math.tanh %50 : vector<2x32xf32>
    %52 = arith.mulf %45, %51 : vector<2x32xf32>
    %c0_25 = arith.constant 0 : index
    %c1_26 = arith.constant 1 : index
    %c0_27 = arith.constant 0 : index
    %53 = vector.load %arg12[%c0_25, %c1_26, %c0_27] : memref<2x8x32xf32, #tpu.memory_space<vmem>>, vector<2x1x32xf32>
    %54 = vector.shape_cast %53 : vector<2x1x32xf32> to vector<2x32xf32>
    %55 = vector.shape_cast %52 : vector<2x32xf32> to vector<2x1x32xf32>
    tpu.vector_store %arg12[%c0_25, %c1_26, %c0_27], %55 {strides = array<i32>} : memref<2x8x32xf32, #tpu.memory_space<vmem>>, vector<2x1x32xf32>,
    %c0_28 = arith.constant 0 : index
    %c2 = arith.constant 2 : index
    %c0_29 = arith.constant 0 : index
    %56 = vector.load %arg11[%c0_28, %c2, %c0_29] : memref<2x8x128xf32, #tpu.memory_space<vmem>>, vector<2x1x128xf32>
    %57 = vector.shape_cast %56 : vector<2x1x128xf32> to vector<2x128xf32>
    %cst_30 = arith.constant dense<0.000000e+00> : vector<2x128xf32>
    %58 = tpu.matmul %52, %3, %cst_30 {dimension_numbers = #tpu.dot_dimension_numbers<[1], [0], [0], [1], [0, 0, 1, 1], [], []>} : vector<2x32xf32>, vector<32x128xf32>, vector<2x128xf32> -> vector<2x128xf32>
    %59 = arith.addf %57, %58 : vector<2x128xf32>
    %60 = arith.negf %59 : vector<2x128xf32>
    %61 = math.exp %60 : vector<2x128xf32>
    %cst_31 = arith.constant 1.000000e+00 : f32
    %62 = vector.broadcast %cst_31 : f32 to vector<2x128xf32>
    %63 = arith.addf %62, %61 : vector<2x128xf32>
    %64 = arith.divf %62, %63 : vector<2x128xf32>
    %65 = vector.extract_strided_slice %64 {offsets = [0, 0], sizes = [2, 32], strides = [1, 1]} : vector<2x128xf32> to vector<2x32xf32>
    %66 = vector.extract_strided_slice %64 {offsets = [0, 32], sizes = [2, 32], strides = [1, 1]} : vector<2x128xf32> to vector<2x32xf32>
    %67 = vector.extract_strided_slice %64 {offsets = [0, 96], sizes = [2, 32], strides = [1, 1]} : vector<2x128xf32> to vector<2x32xf32>
    %68 = vector.extract_strided_slice %59 {offsets = [0, 64], sizes = [2, 32], strides = [1, 1]} : vector<2x128xf32> to vector<2x32xf32>
    %69 = math.tanh %68 : vector<2x32xf32>
    %70 = arith.mulf %66, %50 : vector<2x32xf32>
    %71 = arith.mulf %65, %69 : vector<2x32xf32>
    %72 = arith.addf %70, %71 : vector<2x32xf32>
    %73 = math.tanh %72 : vector<2x32xf32>
    %74 = arith.mulf %67, %73 : vector<2x32xf32>
    %c0_32 = arith.constant 0 : index
    %c2_33 = arith.constant 2 : index
    %c0_34 = arith.constant 0 : index
    %75 = vector.load %arg12[%c0_32, %c2_33, %c0_34] : memref<2x8x32xf32, #tpu.memory_space<vmem>>, vector<2x1x32xf32>
    %76 = vector.shape_cast %75 : vector<2x1x32xf32> to vector<2x32xf32>
    %77 = vector.shape_cast %74 : vector<2x32xf32> to vector<2x1x32xf32>
    tpu.vector_store %arg12[%c0_32, %c2_33, %c0_34], %77 {strides = array<i32>} : memref<2x8x32xf32, #tpu.memory_space<vmem>>, vector<2x1x32xf32>,
    %c0_35 = arith.constant 0 : index
    %c3 = arith.constant 3 : index
    %c0_36 = arith.constant 0 : index
    %78 = vector.load %arg11[%c0_35, %c3, %c0_36] : memref<2x8x128xf32, #tpu.memory_space<vmem>>, vector<2x1x128xf32>
    %79 = vector.shape_cast %78 : vector<2x1x128xf32> to vector<2x128xf32>
    %cst_37 = arith.constant dense<0.000000e+00> : vector<2x128xf32>
    %80 = tpu.matmul %74, %3, %cst_37 {dimension_numbers = #tpu.dot_dimension_numbers<[1], [0], [0], [1], [0, 0, 1, 1], [], []>} : vector<2x32xf32>, vector<32x128xf32>, vector<2x128xf32> -> vector<2x128xf32>
    %81 = arith.addf %79, %80 : vector<2x128xf32>
    %82 = arith.negf %81 : vector<2x128xf32>
    %83 = math.exp %82 : vector<2x128xf32>
    %cst_38 = arith.constant 1.000000e+00 : f32
    %84 = vector.broadcast %cst_38 : f32 to vector<2x128xf32>
    %85 = arith.addf %84, %83 : vector<2x128xf32>
    %86 = arith.divf %84, %85 : vector<2x128xf32>
    %87 = vector.extract_strided_slice %86 {offsets = [0, 0], sizes = [2, 32], strides = [1, 1]} : vector<2x128xf32> to vector<2x32xf32>
    %88 = vector.extract_strided_slice %86 {offsets = [0, 32], sizes = [2, 32], strides = [1, 1]} : vector<2x128xf32> to vector<2x32xf32>
    %89 = vector.extract_strided_slice %86 {offsets = [0, 96], sizes = [2, 32], strides = [1, 1]} : vector<2x128xf32> to vector<2x32xf32>
    %90 = vector.extract_strided_slice %81 {offsets = [0, 64], sizes = [2, 32], strides = [1, 1]} : vector<2x128xf32> to vector<2x32xf32>
    %91 = math.tanh %90 : vector<2x32xf32>
    %92 = arith.mulf %88, %72 : vector<2x32xf32>
    %93 = arith.mulf %87, %91 : vector<2x32xf32>
    %94 = arith.addf %92, %93 : vector<2x32xf32>
    %95 = math.tanh %94 : vector<2x32xf32>
    %96 = arith.mulf %89, %95 : vector<2x32xf32>
    %c0_39 = arith.constant 0 : index
    %c3_40 = arith.constant 3 : index
    %c0_41 = arith.constant 0 : index
    %97 = vector.load %arg12[%c0_39, %c3_40, %c0_41] : memref<2x8x32xf32, #tpu.memory_space<vmem>>, vector<2x1x32xf32>
    %98 = vector.shape_cast %97 : vector<2x1x32xf32> to vector<2x32xf32>
    %99 = vector.shape_cast %96 : vector<2x32xf32> to vector<2x1x32xf32>
    tpu.vector_store %arg12[%c0_39, %c3_40, %c0_41], %99 {strides = array<i32>} : memref<2x8x32xf32, #tpu.memory_space<vmem>>, vector<2x1x32xf32>,
    %c0_42 = arith.constant 0 : index
    %c4 = arith.constant 4 : index
    %c0_43 = arith.constant 0 : index
    %100 = vector.load %arg11[%c0_42, %c4, %c0_43] : memref<2x8x128xf32, #tpu.memory_space<vmem>>, vector<2x1x128xf32>
    %101 = vector.shape_cast %100 : vector<2x1x128xf32> to vector<2x128xf32>
    %cst_44 = arith.constant dense<0.000000e+00> : vector<2x128xf32>
    %102 = tpu.matmul %96, %3, %cst_44 {dimension_numbers = #tpu.dot_dimension_numbers<[1], [0], [0], [1], [0, 0, 1, 1], [], []>} : vector<2x32xf32>, vector<32x128xf32>, vector<2x128xf32> -> vector<2x128xf32>
    %103 = arith.addf %101, %102 : vector<2x128xf32>
    %104 = arith.negf %103 : vector<2x128xf32>
    %105 = math.exp %104 : vector<2x128xf32>
    %cst_45 = arith.constant 1.000000e+00 : f32
    %106 = vector.broadcast %cst_45 : f32 to vector<2x128xf32>
    %107 = arith.addf %106, %105 : vector<2x128xf32>
    %108 = arith.divf %106, %107 : vector<2x128xf32>
    %109 = vector.extract_strided_slice %108 {offsets = [0, 0], sizes = [2, 32], strides = [1, 1]} : vector<2x128xf32> to vector<2x32xf32>
    %110 = vector.extract_strided_slice %108 {offsets = [0, 32], sizes = [2, 32], strides = [1, 1]} : vector<2x128xf32> to vector<2x32xf32>
    %111 = vector.extract_strided_slice %108 {offsets = [0, 96], sizes = [2, 32], strides = [1, 1]} : vector<2x128xf32> to vector<2x32xf32>
    %112 = vector.extract_strided_slice %103 {offsets = [0, 64], sizes = [2, 32], strides = [1, 1]} : vector<2x128xf32> to vector<2x32xf32>
    %113 = math.tanh %112 : vector<2x32xf32>
    %114 = arith.mulf %110, %94 : vector<2x32xf32>
    %115 = arith.mulf %109, %113 : vector<2x32xf32>
    %116 = arith.addf %114, %115 : vector<2x32xf32>
    %117 = math.tanh %116 : vector<2x32xf32>
    %118 = arith.mulf %111, %117 : vector<2x32xf32>
    %c0_46 = arith.constant 0 : index
    %c4_47 = arith.constant 4 : index
    %c0_48 = arith.constant 0 : index
    %119 = vector.load %arg12[%c0_46, %c4_47, %c0_48] : memref<2x8x32xf32, #tpu.memory_space<vmem>>, vector<2x1x32xf32>
    %120 = vector.shape_cast %119 : vector<2x1x32xf32> to vector<2x32xf32>
    %121 = vector.shape_cast %118 : vector<2x32xf32> to vector<2x1x32xf32>
    tpu.vector_store %arg12[%c0_46, %c4_47, %c0_48], %121 {strides = array<i32>} : memref<2x8x32xf32, #tpu.memory_space<vmem>>, vector<2x1x32xf32>,
    %c0_49 = arith.constant 0 : index
    %c5 = arith.constant 5 : index
    %c0_50 = arith.constant 0 : index
    %122 = vector.load %arg11[%c0_49, %c5, %c0_50] : memref<2x8x128xf32, #tpu.memory_space<vmem>>, vector<2x1x128xf32>
    %123 = vector.shape_cast %122 : vector<2x1x128xf32> to vector<2x128xf32>
    %cst_51 = arith.constant dense<0.000000e+00> : vector<2x128xf32>
    %124 = tpu.matmul %118, %3, %cst_51 {dimension_numbers = #tpu.dot_dimension_numbers<[1], [0], [0], [1], [0, 0, 1, 1], [], []>} : vector<2x32xf32>, vector<32x128xf32>, vector<2x128xf32> -> vector<2x128xf32>
    %125 = arith.addf %123, %124 : vector<2x128xf32>
    %126 = arith.negf %125 : vector<2x128xf32>
    %127 = math.exp %126 : vector<2x128xf32>
    %cst_52 = arith.constant 1.000000e+00 : f32
    %128 = vector.broadcast %cst_52 : f32 to vector<2x128xf32>
    %129 = arith.addf %128, %127 : vector<2x128xf32>
    %130 = arith.divf %128, %129 : vector<2x128xf32>
    %131 = vector.extract_strided_slice %130 {offsets = [0, 0], sizes = [2, 32], strides = [1, 1]} : vector<2x128xf32> to vector<2x32xf32>
    %132 = vector.extract_strided_slice %130 {offsets = [0, 32], sizes = [2, 32], strides = [1, 1]} : vector<2x128xf32> to vector<2x32xf32>
    %133 = vector.extract_strided_slice %130 {offsets = [0, 96], sizes = [2, 32], strides = [1, 1]} : vector<2x128xf32> to vector<2x32xf32>
    %134 = vector.extract_strided_slice %125 {offsets = [0, 64], sizes = [2, 32], strides = [1, 1]} : vector<2x128xf32> to vector<2x32xf32>
    %135 = math.tanh %134 : vector<2x32xf32>
    %136 = arith.mulf %132, %116 : vector<2x32xf32>
    %137 = arith.mulf %131, %135 : vector<2x32xf32>
    %138 = arith.addf %136, %137 : vector<2x32xf32>
    %139 = math.tanh %138 : vector<2x32xf32>
    %140 = arith.mulf %133, %139 : vector<2x32xf32>
    %c0_53 = arith.constant 0 : index
    %c5_54 = arith.constant 5 : index
    %c0_55 = arith.constant 0 : index
    %141 = vector.load %arg12[%c0_53, %c5_54, %c0_55] : memref<2x8x32xf32, #tpu.memory_space<vmem>>, vector<2x1x32xf32>
    %142 = vector.shape_cast %141 : vector<2x1x32xf32> to vector<2x32xf32>
    %143 = vector.shape_cast %140 : vector<2x32xf32> to vector<2x1x32xf32>
    tpu.vector_store %arg12[%c0_53, %c5_54, %c0_55], %143 {strides = array<i32>} : memref<2x8x32xf32, #tpu.memory_space<vmem>>, vector<2x1x32xf32>,
    %c0_56 = arith.constant 0 : index
    %c6 = arith.constant 6 : index
    %c0_57 = arith.constant 0 : index
    %144 = vector.load %arg11[%c0_56, %c6, %c0_57] : memref<2x8x128xf32, #tpu.memory_space<vmem>>, vector<2x1x128xf32>
    %145 = vector.shape_cast %144 : vector<2x1x128xf32> to vector<2x128xf32>
    %cst_58 = arith.constant dense<0.000000e+00> : vector<2x128xf32>
    %146 = tpu.matmul %140, %3, %cst_58 {dimension_numbers = #tpu.dot_dimension_numbers<[1], [0], [0], [1], [0, 0, 1, 1], [], []>} : vector<2x32xf32>, vector<32x128xf32>, vector<2x128xf32> -> vector<2x128xf32>
    %147 = arith.addf %145, %146 : vector<2x128xf32>
    %148 = arith.negf %147 : vector<2x128xf32>
    %149 = math.exp %148 : vector<2x128xf32>
    %cst_59 = arith.constant 1.000000e+00 : f32
    %150 = vector.broadcast %cst_59 : f32 to vector<2x128xf32>
    %151 = arith.addf %150, %149 : vector<2x128xf32>
    %152 = arith.divf %150, %151 : vector<2x128xf32>
    %153 = vector.extract_strided_slice %152 {offsets = [0, 0], sizes = [2, 32], strides = [1, 1]} : vector<2x128xf32> to vector<2x32xf32>
    %154 = vector.extract_strided_slice %152 {offsets = [0, 32], sizes = [2, 32], strides = [1, 1]} : vector<2x128xf32> to vector<2x32xf32>
    %155 = vector.extract_strided_slice %152 {offsets = [0, 96], sizes = [2, 32], strides = [1, 1]} : vector<2x128xf32> to vector<2x32xf32>
    %156 = vector.extract_strided_slice %147 {offsets = [0, 64], sizes = [2, 32], strides = [1, 1]} : vector<2x128xf32> to vector<2x32xf32>
    %157 = math.tanh %156 : vector<2x32xf32>
    %158 = arith.mulf %154, %138 : vector<2x32xf32>
    %159 = arith.mulf %153, %157 : vector<2x32xf32>
    %160 = arith.addf %158, %159 : vector<2x32xf32>
    %161 = math.tanh %160 : vector<2x32xf32>
    %162 = arith.mulf %155, %161 : vector<2x32xf32>
    %c0_60 = arith.constant 0 : index
    %c6_61 = arith.constant 6 : index
    %c0_62 = arith.constant 0 : index
    %163 = vector.load %arg12[%c0_60, %c6_61, %c0_62] : memref<2x8x32xf32, #tpu.memory_space<vmem>>, vector<2x1x32xf32>
    %164 = vector.shape_cast %163 : vector<2x1x32xf32> to vector<2x32xf32>
    %165 = vector.shape_cast %162 : vector<2x32xf32> to vector<2x1x32xf32>
    tpu.vector_store %arg12[%c0_60, %c6_61, %c0_62], %165 {strides = array<i32>} : memref<2x8x32xf32, #tpu.memory_space<vmem>>, vector<2x1x32xf32>,
    %c0_63 = arith.constant 0 : index
    %c7 = arith.constant 7 : index
    %c0_64 = arith.constant 0 : index
    %166 = vector.load %arg11[%c0_63, %c7, %c0_64] : memref<2x8x128xf32, #tpu.memory_space<vmem>>, vector<2x1x128xf32>
    %167 = vector.shape_cast %166 : vector<2x1x128xf32> to vector<2x128xf32>
    %cst_65 = arith.constant dense<0.000000e+00> : vector<2x128xf32>
    %168 = tpu.matmul %162, %3, %cst_65 {dimension_numbers = #tpu.dot_dimension_numbers<[1], [0], [0], [1], [0, 0, 1, 1], [], []>} : vector<2x32xf32>, vector<32x128xf32>, vector<2x128xf32> -> vector<2x128xf32>
    %169 = arith.addf %167, %168 : vector<2x128xf32>
    %170 = arith.negf %169 : vector<2x128xf32>
    %171 = math.exp %170 : vector<2x128xf32>
    %cst_66 = arith.constant 1.000000e+00 : f32
    %172 = vector.broadcast %cst_66 : f32 to vector<2x128xf32>
    %173 = arith.addf %172, %171 : vector<2x128xf32>
    %174 = arith.divf %172, %173 : vector<2x128xf32>
    %175 = vector.extract_strided_slice %174 {offsets = [0, 0], sizes = [2, 32], strides = [1, 1]} : vector<2x128xf32> to vector<2x32xf32>
    %176 = vector.extract_strided_slice %174 {offsets = [0, 32], sizes = [2, 32], strides = [1, 1]} : vector<2x128xf32> to vector<2x32xf32>
    %177 = vector.extract_strided_slice %174 {offsets = [0, 96], sizes = [2, 32], strides = [1, 1]} : vector<2x128xf32> to vector<2x32xf32>
    %178 = vector.extract_strided_slice %169 {offsets = [0, 64], sizes = [2, 32], strides = [1, 1]} : vector<2x128xf32> to vector<2x32xf32>
    %179 = math.tanh %178 : vector<2x32xf32>
    %180 = arith.mulf %176, %160 : vector<2x32xf32>
    %181 = arith.mulf %175, %179 : vector<2x32xf32>
    %182 = arith.addf %180, %181 : vector<2x32xf32>
    %183 = math.tanh %182 : vector<2x32xf32>
    %184 = arith.mulf %177, %183 : vector<2x32xf32>
    %c0_67 = arith.constant 0 : index
    %c7_68 = arith.constant 7 : index
    %c0_69 = arith.constant 0 : index
    %185 = vector.load %arg12[%c0_67, %c7_68, %c0_69] : memref<2x8x32xf32, #tpu.memory_space<vmem>>, vector<2x1x32xf32>
    %186 = vector.shape_cast %185 : vector<2x1x32xf32> to vector<2x32xf32>
    %187 = vector.shape_cast %184 : vector<2x32xf32> to vector<2x1x32xf32>
    tpu.vector_store %arg12[%c0_67, %c7_68, %c0_69], %187 {strides = array<i32>} : memref<2x8x32xf32, #tpu.memory_space<vmem>>, vector<2x1x32xf32>,
    %c0_70 = arith.constant 0 : index
    %c0_71 = arith.constant 0 : index
    %c0_72 = arith.constant 0 : index
    %188 = vector.load %arg12[%c0_70, %c0_71, %c0_72] : memref<2x8x32xf32, #tpu.memory_space<vmem>>, vector<2x8x32xf32>
    %189 = vector.shape_cast %188 : vector<2x8x32xf32> to vector<16x32xf32>
    %c0_73 = arith.constant 0 : index
    %c0_74 = arith.constant 0 : index
    %190 = vector.load %arg5[%c0_73, %c0_74] : memref<32x128xf32, #tpu.memory_space<vmem>>, vector<32x128xf32>
    %c0_75 = arith.constant 0 : index
    %c0_76 = arith.constant 0 : index
    %191 = vector.load %arg6[%c0_75, %c0_76] : memref<32x128xf32, #tpu.memory_space<vmem>>, vector<32x128xf32>
    %c0_77 = arith.constant 0 : index
    %c0_78 = arith.constant 0 : index
    %192 = vector.load %arg7[%c0_77, %c0_78] : memref<1x128xf32, #tpu.memory_space<vmem>>, vector<1x128xf32>
    %cst_79 = arith.constant dense<0.000000e+00> : vector<16x128xf32>
    %193 = tpu.matmul %189, %190, %cst_79 {dimension_numbers = #tpu.dot_dimension_numbers<[1], [0], [0], [1], [0, 0, 1, 1], [], []>} : vector<16x32xf32>, vector<32x128xf32>, vector<16x128xf32> -> vector<16x128xf32>
    %194 = vector.broadcast %192 : vector<1x128xf32> to vector<16x128xf32>
    %195 = arith.addf %193, %194 : vector<16x128xf32>
    %196 = vector.shape_cast %195 : vector<16x128xf32> to vector<2x8x128xf32>
    %c0_80 = arith.constant 0 : index
    %c0_81 = arith.constant 0 : index
    %c0_82 = arith.constant 0 : index
    %197 = vector.load %arg11[%c0_80, %c0_81, %c0_82] : memref<2x8x128xf32, #tpu.memory_space<vmem>>, vector<2x8x128xf32>
    tpu.vector_store %arg11[%c0_80, %c0_81, %c0_82], %196 {strides = array<i32>} : memref<2x8x128xf32, #tpu.memory_space<vmem>>, vector<2x8x128xf32>,
    %cst_83 = arith.constant 0.000000e+00 : f32
    %198 = vector.broadcast %cst_83 : f32 to vector<2x32xf32>
    %cst_84 = arith.constant 0.000000e+00 : f32
    %199 = vector.broadcast %cst_84 : f32 to vector<2x32xf32>
    %c0_85 = arith.constant 0 : index
    %c0_86 = arith.constant 0 : index
    %c0_87 = arith.constant 0 : index
    %200 = vector.load %arg11[%c0_85, %c0_86, %c0_87] : memref<2x8x128xf32, #tpu.memory_space<vmem>>, vector<2x1x128xf32>
    %201 = vector.shape_cast %200 : vector<2x1x128xf32> to vector<2x128xf32>
    %cst_88 = arith.constant dense<0.000000e+00> : vector<2x128xf32>
    %202 = tpu.matmul %198, %191, %cst_88 {dimension_numbers = #tpu.dot_dimension_numbers<[1], [0], [0], [1], [0, 0, 1, 1], [], []>} : vector<2x32xf32>, vector<32x128xf32>, vector<2x128xf32> -> vector<2x128xf32>
    %203 = arith.addf %201, %202 : vector<2x128xf32>
    %204 = arith.negf %203 : vector<2x128xf32>
    %205 = math.exp %204 : vector<2x128xf32>
    %cst_89 = arith.constant 1.000000e+00 : f32
    %206 = vector.broadcast %cst_89 : f32 to vector<2x128xf32>
    %207 = arith.addf %206, %205 : vector<2x128xf32>
    %208 = arith.divf %206, %207 : vector<2x128xf32>
    %209 = vector.extract_strided_slice %208 {offsets = [0, 0], sizes = [2, 32], strides = [1, 1]} : vector<2x128xf32> to vector<2x32xf32>
    %210 = vector.extract_strided_slice %208 {offsets = [0, 32], sizes = [2, 32], strides = [1, 1]} : vector<2x128xf32> to vector<2x32xf32>
    %211 = vector.extract_strided_slice %208 {offsets = [0, 96], sizes = [2, 32], strides = [1, 1]} : vector<2x128xf32> to vector<2x32xf32>
    %212 = vector.extract_strided_slice %203 {offsets = [0, 64], sizes = [2, 32], strides = [1, 1]} : vector<2x128xf32> to vector<2x32xf32>
    %213 = math.tanh %212 : vector<2x32xf32>
    %214 = arith.mulf %210, %199 : vector<2x32xf32>
    %215 = arith.mulf %209, %213 : vector<2x32xf32>
    %216 = arith.addf %214, %215 : vector<2x32xf32>
    %217 = math.tanh %216 : vector<2x32xf32>
    %218 = arith.mulf %211, %217 : vector<2x32xf32>
    %c0_90 = arith.constant 0 : index
    %c0_91 = arith.constant 0 : index
    %c0_92 = arith.constant 0 : index
    %219 = vector.load %arg12[%c0_90, %c0_91, %c0_92] : memref<2x8x32xf32, #tpu.memory_space<vmem>>, vector<2x1x32xf32>
    %220 = vector.shape_cast %219 : vector<2x1x32xf32> to vector<2x32xf32>
    %221 = vector.shape_cast %218 : vector<2x32xf32> to vector<2x1x32xf32>
    tpu.vector_store %arg12[%c0_90, %c0_91, %c0_92], %221 {strides = array<i32>} : memref<2x8x32xf32, #tpu.memory_space<vmem>>, vector<2x1x32xf32>,
    %c0_93 = arith.constant 0 : index
    %c1_94 = arith.constant 1 : index
    %c0_95 = arith.constant 0 : index
    %222 = vector.load %arg11[%c0_93, %c1_94, %c0_95] : memref<2x8x128xf32, #tpu.memory_space<vmem>>, vector<2x1x128xf32>
    %223 = vector.shape_cast %222 : vector<2x1x128xf32> to vector<2x128xf32>
    %cst_96 = arith.constant dense<0.000000e+00> : vector<2x128xf32>
    %224 = tpu.matmul %218, %191, %cst_96 {dimension_numbers = #tpu.dot_dimension_numbers<[1], [0], [0], [1], [0, 0, 1, 1], [], []>} : vector<2x32xf32>, vector<32x128xf32>, vector<2x128xf32> -> vector<2x128xf32>
    %225 = arith.addf %223, %224 : vector<2x128xf32>
    %226 = arith.negf %225 : vector<2x128xf32>
    %227 = math.exp %226 : vector<2x128xf32>
    %cst_97 = arith.constant 1.000000e+00 : f32
    %228 = vector.broadcast %cst_97 : f32 to vector<2x128xf32>
    %229 = arith.addf %228, %227 : vector<2x128xf32>
    %230 = arith.divf %228, %229 : vector<2x128xf32>
    %231 = vector.extract_strided_slice %230 {offsets = [0, 0], sizes = [2, 32], strides = [1, 1]} : vector<2x128xf32> to vector<2x32xf32>
    %232 = vector.extract_strided_slice %230 {offsets = [0, 32], sizes = [2, 32], strides = [1, 1]} : vector<2x128xf32> to vector<2x32xf32>
    %233 = vector.extract_strided_slice %230 {offsets = [0, 96], sizes = [2, 32], strides = [1, 1]} : vector<2x128xf32> to vector<2x32xf32>
    %234 = vector.extract_strided_slice %225 {offsets = [0, 64], sizes = [2, 32], strides = [1, 1]} : vector<2x128xf32> to vector<2x32xf32>
    %235 = math.tanh %234 : vector<2x32xf32>
    %236 = arith.mulf %232, %216 : vector<2x32xf32>
    %237 = arith.mulf %231, %235 : vector<2x32xf32>
    %238 = arith.addf %236, %237 : vector<2x32xf32>
    %239 = math.tanh %238 : vector<2x32xf32>
    %240 = arith.mulf %233, %239 : vector<2x32xf32>
    %c0_98 = arith.constant 0 : index
    %c1_99 = arith.constant 1 : index
    %c0_100 = arith.constant 0 : index
    %241 = vector.load %arg12[%c0_98, %c1_99, %c0_100] : memref<2x8x32xf32, #tpu.memory_space<vmem>>, vector<2x1x32xf32>
    %242 = vector.shape_cast %241 : vector<2x1x32xf32> to vector<2x32xf32>
    %243 = vector.shape_cast %240 : vector<2x32xf32> to vector<2x1x32xf32>
    tpu.vector_store %arg12[%c0_98, %c1_99, %c0_100], %243 {strides = array<i32>} : memref<2x8x32xf32, #tpu.memory_space<vmem>>, vector<2x1x32xf32>,
    %c0_101 = arith.constant 0 : index
    %c2_102 = arith.constant 2 : index
    %c0_103 = arith.constant 0 : index
    %244 = vector.load %arg11[%c0_101, %c2_102, %c0_103] : memref<2x8x128xf32, #tpu.memory_space<vmem>>, vector<2x1x128xf32>
    %245 = vector.shape_cast %244 : vector<2x1x128xf32> to vector<2x128xf32>
    %cst_104 = arith.constant dense<0.000000e+00> : vector<2x128xf32>
    %246 = tpu.matmul %240, %191, %cst_104 {dimension_numbers = #tpu.dot_dimension_numbers<[1], [0], [0], [1], [0, 0, 1, 1], [], []>} : vector<2x32xf32>, vector<32x128xf32>, vector<2x128xf32> -> vector<2x128xf32>
    %247 = arith.addf %245, %246 : vector<2x128xf32>
    %248 = arith.negf %247 : vector<2x128xf32>
    %249 = math.exp %248 : vector<2x128xf32>
    %cst_105 = arith.constant 1.000000e+00 : f32
    %250 = vector.broadcast %cst_105 : f32 to vector<2x128xf32>
    %251 = arith.addf %250, %249 : vector<2x128xf32>
    %252 = arith.divf %250, %251 : vector<2x128xf32>
    %253 = vector.extract_strided_slice %252 {offsets = [0, 0], sizes = [2, 32], strides = [1, 1]} : vector<2x128xf32> to vector<2x32xf32>
    %254 = vector.extract_strided_slice %252 {offsets = [0, 32], sizes = [2, 32], strides = [1, 1]} : vector<2x128xf32> to vector<2x32xf32>
    %255 = vector.extract_strided_slice %252 {offsets = [0, 96], sizes = [2, 32], strides = [1, 1]} : vector<2x128xf32> to vector<2x32xf32>
    %256 = vector.extract_strided_slice %247 {offsets = [0, 64], sizes = [2, 32], strides = [1, 1]} : vector<2x128xf32> to vector<2x32xf32>
    %257 = math.tanh %256 : vector<2x32xf32>
    %258 = arith.mulf %254, %238 : vector<2x32xf32>
    %259 = arith.mulf %253, %257 : vector<2x32xf32>
    %260 = arith.addf %258, %259 : vector<2x32xf32>
    %261 = math.tanh %260 : vector<2x32xf32>
    %262 = arith.mulf %255, %261 : vector<2x32xf32>
    %c0_106 = arith.constant 0 : index
    %c2_107 = arith.constant 2 : index
    %c0_108 = arith.constant 0 : index
    %263 = vector.load %arg12[%c0_106, %c2_107, %c0_108] : memref<2x8x32xf32, #tpu.memory_space<vmem>>, vector<2x1x32xf32>
    %264 = vector.shape_cast %263 : vector<2x1x32xf32> to vector<2x32xf32>
    %265 = vector.shape_cast %262 : vector<2x32xf32> to vector<2x1x32xf32>
    tpu.vector_store %arg12[%c0_106, %c2_107, %c0_108], %265 {strides = array<i32>} : memref<2x8x32xf32, #tpu.memory_space<vmem>>, vector<2x1x32xf32>,
    %c0_109 = arith.constant 0 : index
    %c3_110 = arith.constant 3 : index
    %c0_111 = arith.constant 0 : index
    %266 = vector.load %arg11[%c0_109, %c3_110, %c0_111] : memref<2x8x128xf32, #tpu.memory_space<vmem>>, vector<2x1x128xf32>
    %267 = vector.shape_cast %266 : vector<2x1x128xf32> to vector<2x128xf32>
    %cst_112 = arith.constant dense<0.000000e+00> : vector<2x128xf32>
    %268 = tpu.matmul %262, %191, %cst_112 {dimension_numbers = #tpu.dot_dimension_numbers<[1], [0], [0], [1], [0, 0, 1, 1], [], []>} : vector<2x32xf32>, vector<32x128xf32>, vector<2x128xf32> -> vector<2x128xf32>
    %269 = arith.addf %267, %268 : vector<2x128xf32>
    %270 = arith.negf %269 : vector<2x128xf32>
    %271 = math.exp %270 : vector<2x128xf32>
    %cst_113 = arith.constant 1.000000e+00 : f32
    %272 = vector.broadcast %cst_113 : f32 to vector<2x128xf32>
    %273 = arith.addf %272, %271 : vector<2x128xf32>
    %274 = arith.divf %272, %273 : vector<2x128xf32>
    %275 = vector.extract_strided_slice %274 {offsets = [0, 0], sizes = [2, 32], strides = [1, 1]} : vector<2x128xf32> to vector<2x32xf32>
    %276 = vector.extract_strided_slice %274 {offsets = [0, 32], sizes = [2, 32], strides = [1, 1]} : vector<2x128xf32> to vector<2x32xf32>
    %277 = vector.extract_strided_slice %274 {offsets = [0, 96], sizes = [2, 32], strides = [1, 1]} : vector<2x128xf32> to vector<2x32xf32>
    %278 = vector.extract_strided_slice %269 {offsets = [0, 64], sizes = [2, 32], strides = [1, 1]} : vector<2x128xf32> to vector<2x32xf32>
    %279 = math.tanh %278 : vector<2x32xf32>
    %280 = arith.mulf %276, %260 : vector<2x32xf32>
    %281 = arith.mulf %275, %279 : vector<2x32xf32>
    %282 = arith.addf %280, %281 : vector<2x32xf32>
    %283 = math.tanh %282 : vector<2x32xf32>
    %284 = arith.mulf %277, %283 : vector<2x32xf32>
    %c0_114 = arith.constant 0 : index
    %c3_115 = arith.constant 3 : index
    %c0_116 = arith.constant 0 : index
    %285 = vector.load %arg12[%c0_114, %c3_115, %c0_116] : memref<2x8x32xf32, #tpu.memory_space<vmem>>, vector<2x1x32xf32>
    %286 = vector.shape_cast %285 : vector<2x1x32xf32> to vector<2x32xf32>
    %287 = vector.shape_cast %284 : vector<2x32xf32> to vector<2x1x32xf32>
    tpu.vector_store %arg12[%c0_114, %c3_115, %c0_116], %287 {strides = array<i32>} : memref<2x8x32xf32, #tpu.memory_space<vmem>>, vector<2x1x32xf32>,
    %c0_117 = arith.constant 0 : index
    %c4_118 = arith.constant 4 : index
    %c0_119 = arith.constant 0 : index
    %288 = vector.load %arg11[%c0_117, %c4_118, %c0_119] : memref<2x8x128xf32, #tpu.memory_space<vmem>>, vector<2x1x128xf32>
    %289 = vector.shape_cast %288 : vector<2x1x128xf32> to vector<2x128xf32>
    %cst_120 = arith.constant dense<0.000000e+00> : vector<2x128xf32>
    %290 = tpu.matmul %284, %191, %cst_120 {dimension_numbers = #tpu.dot_dimension_numbers<[1], [0], [0], [1], [0, 0, 1, 1], [], []>} : vector<2x32xf32>, vector<32x128xf32>, vector<2x128xf32> -> vector<2x128xf32>
    %291 = arith.addf %289, %290 : vector<2x128xf32>
    %292 = arith.negf %291 : vector<2x128xf32>
    %293 = math.exp %292 : vector<2x128xf32>
    %cst_121 = arith.constant 1.000000e+00 : f32
    %294 = vector.broadcast %cst_121 : f32 to vector<2x128xf32>
    %295 = arith.addf %294, %293 : vector<2x128xf32>
    %296 = arith.divf %294, %295 : vector<2x128xf32>
    %297 = vector.extract_strided_slice %296 {offsets = [0, 0], sizes = [2, 32], strides = [1, 1]} : vector<2x128xf32> to vector<2x32xf32>
    %298 = vector.extract_strided_slice %296 {offsets = [0, 32], sizes = [2, 32], strides = [1, 1]} : vector<2x128xf32> to vector<2x32xf32>
    %299 = vector.extract_strided_slice %296 {offsets = [0, 96], sizes = [2, 32], strides = [1, 1]} : vector<2x128xf32> to vector<2x32xf32>
    %300 = vector.extract_strided_slice %291 {offsets = [0, 64], sizes = [2, 32], strides = [1, 1]} : vector<2x128xf32> to vector<2x32xf32>
    %301 = math.tanh %300 : vector<2x32xf32>
    %302 = arith.mulf %298, %282 : vector<2x32xf32>
    %303 = arith.mulf %297, %301 : vector<2x32xf32>
    %304 = arith.addf %302, %303 : vector<2x32xf32>
    %305 = math.tanh %304 : vector<2x32xf32>
    %306 = arith.mulf %299, %305 : vector<2x32xf32>
    %c0_122 = arith.constant 0 : index
    %c4_123 = arith.constant 4 : index
    %c0_124 = arith.constant 0 : index
    %307 = vector.load %arg12[%c0_122, %c4_123, %c0_124] : memref<2x8x32xf32, #tpu.memory_space<vmem>>, vector<2x1x32xf32>
    %308 = vector.shape_cast %307 : vector<2x1x32xf32> to vector<2x32xf32>
    %309 = vector.shape_cast %306 : vector<2x32xf32> to vector<2x1x32xf32>
    tpu.vector_store %arg12[%c0_122, %c4_123, %c0_124], %309 {strides = array<i32>} : memref<2x8x32xf32, #tpu.memory_space<vmem>>, vector<2x1x32xf32>,
    %c0_125 = arith.constant 0 : index
    %c5_126 = arith.constant 5 : index
    %c0_127 = arith.constant 0 : index
    %310 = vector.load %arg11[%c0_125, %c5_126, %c0_127] : memref<2x8x128xf32, #tpu.memory_space<vmem>>, vector<2x1x128xf32>
    %311 = vector.shape_cast %310 : vector<2x1x128xf32> to vector<2x128xf32>
    %cst_128 = arith.constant dense<0.000000e+00> : vector<2x128xf32>
    %312 = tpu.matmul %306, %191, %cst_128 {dimension_numbers = #tpu.dot_dimension_numbers<[1], [0], [0], [1], [0, 0, 1, 1], [], []>} : vector<2x32xf32>, vector<32x128xf32>, vector<2x128xf32> -> vector<2x128xf32>
    %313 = arith.addf %311, %312 : vector<2x128xf32>
    %314 = arith.negf %313 : vector<2x128xf32>
    %315 = math.exp %314 : vector<2x128xf32>
    %cst_129 = arith.constant 1.000000e+00 : f32
    %316 = vector.broadcast %cst_129 : f32 to vector<2x128xf32>
    %317 = arith.addf %316, %315 : vector<2x128xf32>
    %318 = arith.divf %316, %317 : vector<2x128xf32>
    %319 = vector.extract_strided_slice %318 {offsets = [0, 0], sizes = [2, 32], strides = [1, 1]} : vector<2x128xf32> to vector<2x32xf32>
    %320 = vector.extract_strided_slice %318 {offsets = [0, 32], sizes = [2, 32], strides = [1, 1]} : vector<2x128xf32> to vector<2x32xf32>
    %321 = vector.extract_strided_slice %318 {offsets = [0, 96], sizes = [2, 32], strides = [1, 1]} : vector<2x128xf32> to vector<2x32xf32>
    %322 = vector.extract_strided_slice %313 {offsets = [0, 64], sizes = [2, 32], strides = [1, 1]} : vector<2x128xf32> to vector<2x32xf32>
    %323 = math.tanh %322 : vector<2x32xf32>
    %324 = arith.mulf %320, %304 : vector<2x32xf32>
    %325 = arith.mulf %319, %323 : vector<2x32xf32>
    %326 = arith.addf %324, %325 : vector<2x32xf32>
    %327 = math.tanh %326 : vector<2x32xf32>
    %328 = arith.mulf %321, %327 : vector<2x32xf32>
    %c0_130 = arith.constant 0 : index
    %c5_131 = arith.constant 5 : index
    %c0_132 = arith.constant 0 : index
    %329 = vector.load %arg12[%c0_130, %c5_131, %c0_132] : memref<2x8x32xf32, #tpu.memory_space<vmem>>, vector<2x1x32xf32>
    %330 = vector.shape_cast %329 : vector<2x1x32xf32> to vector<2x32xf32>
    %331 = vector.shape_cast %328 : vector<2x32xf32> to vector<2x1x32xf32>
    tpu.vector_store %arg12[%c0_130, %c5_131, %c0_132], %331 {strides = array<i32>} : memref<2x8x32xf32, #tpu.memory_space<vmem>>, vector<2x1x32xf32>,
    %c0_133 = arith.constant 0 : index
    %c6_134 = arith.constant 6 : index
    %c0_135 = arith.constant 0 : index
    %332 = vector.load %arg11[%c0_133, %c6_134, %c0_135] : memref<2x8x128xf32, #tpu.memory_space<vmem>>, vector<2x1x128xf32>
    %333 = vector.shape_cast %332 : vector<2x1x128xf32> to vector<2x128xf32>
    %cst_136 = arith.constant dense<0.000000e+00> : vector<2x128xf32>
    %334 = tpu.matmul %328, %191, %cst_136 {dimension_numbers = #tpu.dot_dimension_numbers<[1], [0], [0], [1], [0, 0, 1, 1], [], []>} : vector<2x32xf32>, vector<32x128xf32>, vector<2x128xf32> -> vector<2x128xf32>
    %335 = arith.addf %333, %334 : vector<2x128xf32>
    %336 = arith.negf %335 : vector<2x128xf32>
    %337 = math.exp %336 : vector<2x128xf32>
    %cst_137 = arith.constant 1.000000e+00 : f32
    %338 = vector.broadcast %cst_137 : f32 to vector<2x128xf32>
    %339 = arith.addf %338, %337 : vector<2x128xf32>
    %340 = arith.divf %338, %339 : vector<2x128xf32>
    %341 = vector.extract_strided_slice %340 {offsets = [0, 0], sizes = [2, 32], strides = [1, 1]} : vector<2x128xf32> to vector<2x32xf32>
    %342 = vector.extract_strided_slice %340 {offsets = [0, 32], sizes = [2, 32], strides = [1, 1]} : vector<2x128xf32> to vector<2x32xf32>
    %343 = vector.extract_strided_slice %340 {offsets = [0, 96], sizes = [2, 32], strides = [1, 1]} : vector<2x128xf32> to vector<2x32xf32>
    %344 = vector.extract_strided_slice %335 {offsets = [0, 64], sizes = [2, 32], strides = [1, 1]} : vector<2x128xf32> to vector<2x32xf32>
    %345 = math.tanh %344 : vector<2x32xf32>
    %346 = arith.mulf %342, %326 : vector<2x32xf32>
    %347 = arith.mulf %341, %345 : vector<2x32xf32>
    %348 = arith.addf %346, %347 : vector<2x32xf32>
    %349 = math.tanh %348 : vector<2x32xf32>
    %350 = arith.mulf %343, %349 : vector<2x32xf32>
    %c0_138 = arith.constant 0 : index
    %c6_139 = arith.constant 6 : index
    %c0_140 = arith.constant 0 : index
    %351 = vector.load %arg12[%c0_138, %c6_139, %c0_140] : memref<2x8x32xf32, #tpu.memory_space<vmem>>, vector<2x1x32xf32>
    %352 = vector.shape_cast %351 : vector<2x1x32xf32> to vector<2x32xf32>
    %353 = vector.shape_cast %350 : vector<2x32xf32> to vector<2x1x32xf32>
    tpu.vector_store %arg12[%c0_138, %c6_139, %c0_140], %353 {strides = array<i32>} : memref<2x8x32xf32, #tpu.memory_space<vmem>>, vector<2x1x32xf32>,
    %c0_141 = arith.constant 0 : index
    %c7_142 = arith.constant 7 : index
    %c0_143 = arith.constant 0 : index
    %354 = vector.load %arg11[%c0_141, %c7_142, %c0_143] : memref<2x8x128xf32, #tpu.memory_space<vmem>>, vector<2x1x128xf32>
    %355 = vector.shape_cast %354 : vector<2x1x128xf32> to vector<2x128xf32>
    %cst_144 = arith.constant dense<0.000000e+00> : vector<2x128xf32>
    %356 = tpu.matmul %350, %191, %cst_144 {dimension_numbers = #tpu.dot_dimension_numbers<[1], [0], [0], [1], [0, 0, 1, 1], [], []>} : vector<2x32xf32>, vector<32x128xf32>, vector<2x128xf32> -> vector<2x128xf32>
    %357 = arith.addf %355, %356 : vector<2x128xf32>
    %358 = arith.negf %357 : vector<2x128xf32>
    %359 = math.exp %358 : vector<2x128xf32>
    %cst_145 = arith.constant 1.000000e+00 : f32
    %360 = vector.broadcast %cst_145 : f32 to vector<2x128xf32>
    %361 = arith.addf %360, %359 : vector<2x128xf32>
    %362 = arith.divf %360, %361 : vector<2x128xf32>
    %363 = vector.extract_strided_slice %362 {offsets = [0, 0], sizes = [2, 32], strides = [1, 1]} : vector<2x128xf32> to vector<2x32xf32>
    %364 = vector.extract_strided_slice %362 {offsets = [0, 32], sizes = [2, 32], strides = [1, 1]} : vector<2x128xf32> to vector<2x32xf32>
    %365 = vector.extract_strided_slice %362 {offsets = [0, 96], sizes = [2, 32], strides = [1, 1]} : vector<2x128xf32> to vector<2x32xf32>
    %366 = vector.extract_strided_slice %357 {offsets = [0, 64], sizes = [2, 32], strides = [1, 1]} : vector<2x128xf32> to vector<2x32xf32>
    %367 = math.tanh %366 : vector<2x32xf32>
    %368 = arith.mulf %364, %348 : vector<2x32xf32>
    %369 = arith.mulf %363, %367 : vector<2x32xf32>
    %370 = arith.addf %368, %369 : vector<2x32xf32>
    %371 = math.tanh %370 : vector<2x32xf32>
    %372 = arith.mulf %365, %371 : vector<2x32xf32>
    %c0_146 = arith.constant 0 : index
    %c7_147 = arith.constant 7 : index
    %c0_148 = arith.constant 0 : index
    %373 = vector.load %arg12[%c0_146, %c7_147, %c0_148] : memref<2x8x32xf32, #tpu.memory_space<vmem>>, vector<2x1x32xf32>
    %374 = vector.shape_cast %373 : vector<2x1x32xf32> to vector<2x32xf32>
    %375 = vector.shape_cast %372 : vector<2x32xf32> to vector<2x1x32xf32>
    tpu.vector_store %arg12[%c0_146, %c7_147, %c0_148], %375 {strides = array<i32>} : memref<2x8x32xf32, #tpu.memory_space<vmem>>, vector<2x1x32xf32>,
    %c0_149 = arith.constant 0 : index
    %c0_150 = arith.constant 0 : index
    %c0_151 = arith.constant 0 : index
    %376 = vector.load %arg12[%c0_149, %c0_150, %c0_151] : memref<2x8x32xf32, #tpu.memory_space<vmem>>, vector<2x8x32xf32>
    %377 = vector.shape_cast %376 : vector<2x8x32xf32> to vector<16x32xf32>
    %c0_152 = arith.constant 0 : index
    %c0_153 = arith.constant 0 : index
    %378 = vector.load %arg8[%c0_152, %c0_153] : memref<32x8xf32, #tpu.memory_space<vmem>>, vector<32x8xf32>
    %cst_154 = arith.constant dense<0.000000e+00> : vector<16x8xf32>
    %379 = tpu.matmul %377, %378, %cst_154 {dimension_numbers = #tpu.dot_dimension_numbers<[1], [0], [0], [1], [0, 0, 1, 1], [], []>} : vector<16x32xf32>, vector<32x8xf32>, vector<16x8xf32> -> vector<16x8xf32>
    %c0_155 = arith.constant 0 : index
    %c0_156 = arith.constant 0 : index
    %380 = vector.load %arg9[%c0_155, %c0_156] : memref<1x8xf32, #tpu.memory_space<vmem>>, vector<1x8xf32>
    %381 = vector.broadcast %380 : vector<1x8xf32> to vector<16x8xf32>
    %382 = arith.addf %379, %381 : vector<16x8xf32>
    %383 = vector.shape_cast %382 : vector<16x8xf32> to vector<2x8x8xf32>
    %c0_157 = arith.constant 0 : index
    %c0_158 = arith.constant 0 : index
    %c0_159 = arith.constant 0 : index
    %384 = vector.load %arg10[%c0_157, %c0_158, %c0_159] : memref<2x8x8xf32, #tpu.memory_space<vmem>>, vector<2x8x8xf32>
    tpu.vector_store %arg10[%c0_157, %c0_158, %c0_159], %383 {strides = array<i32>} : memref<2x8x8xf32, #tpu.memory_space<vmem>>, vector<2x8x8xf32>,
    return
  }
  func.func @transform_0(%arg0: i32) -> (i32, i32, i32) {
    %c0_i32 = arith.constant 0 : i32
    %c0_i32_0 = arith.constant 0 : i32
    %c0_i32_1 = arith.constant 0 : i32
    return %arg0, %c0_i32, %c0_i32_0 : i32, i32, i32
  }
  func.func @transform_1(%arg0: i32) -> (i32, i32) {
    %c0_i32 = arith.constant 0 : i32
    %c0_i32_0 = arith.constant 0 : i32
    %c0_i32_1 = arith.constant 0 : i32
    return %c0_i32, %c0_i32_0 : i32, i32
  }
  func.func @transform_2(%arg0: i32) -> (i32, i32) {
    %c0_i32 = arith.constant 0 : i32
    %c0_i32_0 = arith.constant 0 : i32
    %c0_i32_1 = arith.constant 0 : i32
    return %c0_i32, %c0_i32_0 : i32, i32
  }
  func.func @transform_3(%arg0: i32) -> (i32, i32) {
    %c0_i32 = arith.constant 0 : i32
    %c0_i32_0 = arith.constant 0 : i32
    %c0_i32_1 = arith.constant 0 : i32
    return %c0_i32, %c0_i32_0 : i32, i32
  }
  func.func @transform_4(%arg0: i32) -> (i32, i32) {
    %c0_i32 = arith.constant 0 : i32
    %c0_i32_0 = arith.constant 0 : i32
    %c0_i32_1 = arith.constant 0 : i32
    return %c0_i32, %c0_i32_0 : i32, i32
  }
  func.func @transform_5(%arg0: i32) -> (i32, i32) {
    %c0_i32 = arith.constant 0 : i32
    %c0_i32_0 = arith.constant 0 : i32
    %c0_i32_1 = arith.constant 0 : i32
    return %c0_i32, %c0_i32_0 : i32, i32
  }
  func.func @transform_6(%arg0: i32) -> (i32, i32) {
    %c0_i32 = arith.constant 0 : i32
    %c0_i32_0 = arith.constant 0 : i32
    %c0_i32_1 = arith.constant 0 : i32
    return %c0_i32, %c0_i32_0 : i32, i32
  }
  func.func @transform_7(%arg0: i32) -> (i32, i32) {
    %c0_i32 = arith.constant 0 : i32
    %c0_i32_0 = arith.constant 0 : i32
    %c0_i32_1 = arith.constant 0 : i32
    return %c0_i32, %c0_i32_0 : i32, i32
  }
  func.func @transform_8(%arg0: i32) -> (i32, i32) {
    %c0_i32 = arith.constant 0 : i32
    %c0_i32_0 = arith.constant 0 : i32
    %c0_i32_1 = arith.constant 0 : i32
    return %c0_i32, %c0_i32_0 : i32, i32
  }
  func.func @transform_9(%arg0: i32) -> (i32, i32, i32) {
    %c0_i32 = arith.constant 0 : i32
    %c0_i32_0 = arith.constant 0 : i32
    %c0_i32_1 = arith.constant 0 : i32
    return %arg0, %c0_i32, %c0_i32_0 : i32, i32, i32
  }
}

</mosaic_0001>

<bundles_post_ra>
// kernel: tpu_custom_call.1
= control target key start
LH: loop header
LB: loop body
LE: loop exit
PB: predicated region body
PF: predicated region fallthrough
CT: control target
= control target key end

     0   :  { %14 = vsyncpa [#allocation5], 0  ;;  %s4125_s0 = inlined_call_operand.hbm [shape: f32[2,8,16], index: 0, kind: input, shape index: {}]   ;;  %s4126_s1 = inlined_call_operand.hbm [shape: f32[16,128], index: 1, kind: input, shape index: {}]   ;;  %s4127_s2 = inlined_call_operand.vmem [shape: f32[32,128], index: 2, kind: input, shape index: {}]   ;;  %s4128_s3 = inlined_call_operand.vmem [shape: f32[1,128], index: 3, kind: input, shape index: {}]   ;;  %s4129_s4 = inlined_call_operand.hbm [shape: f32[32,128], index: 4, kind: input, shape index: {}]   ;;  %s4130_s5 = inlined_call_operand.hbm [shape: f32[32,128], index: 5, kind: input, shape index: {}]   ;;  %s4131_s6 = inlined_call_operand.vmem [shape: f32[1,128], index: 6, kind: input, shape index: {}]   ;;  %s4132_s7 = inlined_call_operand.vmem [shape: f32[32,8], index: 7, kind: input, shape index: {}]   ;;  %s4133_s8 = inlined_call_operand.vmem [shape: f32[1,8], index: 8, kind: input, shape index: {}]   ;;  %s4134_s9 = inlined_call_operand.hbm [shape: f32[2,8,8], index: 9, kind: output, shape index: {}]  }
   0x1   :  { %15 = vsyncpa [#allocation8], 0 }
   0x2   :  { %16 = vsyncpa [#allocation11], 0 }
   0x3   :  { %17 = vsyncpa [#allocation6], 0  ;;  %s3527_s30 = smov [#allocation7]   ;;  %s3528_s11 = smov [#allocation4]  }
   0x4   :  { %s35_s10 = sshll.u32 %s3527_s30, 4  ;;  %s23_s12 = sshll.u32 %s3528_s11, 4  ;;  %s36_s10 = int_to_ptr.vmem [resolvable:$true] %s35_s10  ;;  %s3589_s12 = int_to_ptr.vmem [resolvable:$true] %s23_s12 }
   0x5   :  { %s3409_s15 = scalar_lea.hbm %s4126_s1, 256 }
   0x6   :  { %p3410_p0 = scmp.ne.s32.totalorder %s4126_s1, %s3409_s15  ;;  %p3413_p1 = scmp.lt.u32.totalorder %s3409_s15, %s4126_s1 }
   0x8   :  { %p3415_p2 = pnand %p3413_p1, %p3410_p0 }
   0xa   :  { %3418 = shalt.err (!%p3415_p2)
}
   0xb   :  { %s3419_s20 = scalar_lea.vmem %s36_s10, 256  ;;  %p3424_p4 = scmp.lt.s32.totalorder %s36_s10, %s36_s10 }
   0xc   :  { %p3420_p3 = scmp.ne.s32.totalorder %s36_s10, %s3419_s20  ;;  %p3425_p5 = scmp.lt.s32.totalorder %s3419_s20, %s3419_s20 }
   0xe   :  { %p3426_p6 = por %p3425_p5, %p3424_p4 }
  0x10   :  { %p3427_p7 = pnand %p3426_p6, %p3420_p3 }
  0x12   :  { %3430 = shalt.err (!%p3427_p7)
}
  0x13   :  { %s3529_s21 = smov 128   ;;  %s3530_s22 = smov 8  }
  0x14   :  { %41 = dma.hbm_to_vmem [thread:$0]  %s4126_s1, 256, %s36_s10, [#allocation8], %s3529_s21, %s3529_s21, %s3530_s22  }
  0x15   :  { %s3431_s27 = scalar_lea.hbm %s4125_s0, 256 }
  0x16   :  { %p3432_p8 = scmp.ne.s32.totalorder %s4125_s0, %s3431_s27  ;;  %p3435_p9 = scmp.lt.u32.totalorder %s3431_s27, %s4125_s0 }
  0x18   :  { %p3437_p10 = pnand %p3435_p9, %p3432_p8 }
  0x1a   :  { %3440 = shalt.err (!%p3437_p10)
}
  0x1b   :  { %s3441_s13 = scalar_lea.vmem %s3589_s12, 256  ;;  %p3446_p12 = scmp.lt.s32.totalorder %s3589_s12, %s3589_s12 }
  0x1c   :  { %p3442_p11 = scmp.ne.s32.totalorder %s3589_s12, %s3441_s13  ;;  %p3447_p13 = scmp.lt.s32.totalorder %s3441_s13, %s3441_s13 }
  0x1e   :  { %p3448_p0 = por %p3447_p13, %p3446_p12 }
  0x20   :  { %p3449_p1 = pnand %p3448_p0, %p3442_p11 }
  0x22   :  { %3452 = shalt.err (!%p3449_p1)
}
  0x23   :  { %29 = dma.hbm_to_vmem [thread:$0]  %s4125_s0, 256, %s3589_s12, [#allocation5], %s3529_s21, %s3529_s21, %s3530_s22  }
  0x24   :  { %s3531_s14 = smov [#allocation9]   ;;  %s3532_s16 = smov [#allocation10]  }
  0x25   :  { %s51_s15 = sshll.u32 %s3531_s14, 4  ;;  %s63_s17 = sshll.u32 %s3532_s16, 4  ;;  %s52_s15 = int_to_ptr.vmem [resolvable:$true] %s51_s15  ;;  %s3626_s17 = int_to_ptr.vmem [resolvable:$true] %s63_s17 }
  0x26   :  { %s3453_s20 = scalar_lea.hbm %s4129_s4, 512 }
  0x27   :  { %p3454_p2 = scmp.ne.s32.totalorder %s4129_s4, %s3453_s20  ;;  %p3457_p3 = scmp.lt.u32.totalorder %s3453_s20, %s4129_s4 }
  0x29   :  { %p3459_p4 = pnand %p3457_p3, %p3454_p2 }
  0x2b   :  { %3462 = shalt.err (!%p3459_p4)
}
  0x2c   :  { %s3463_s0 = scalar_lea.vmem %s52_s15, 512  ;;  %p3468_p6 = scmp.lt.s32.totalorder %s52_s15, %s52_s15 }
  0x2d   :  { %p3464_p5 = scmp.ne.s32.totalorder %s52_s15, %s3463_s0  ;;  %p3469_p7 = scmp.lt.s32.totalorder %s3463_s0, %s3463_s0 }
  0x2f   :  { %p3470_p8 = por %p3469_p7, %p3468_p6 }
  0x31   :  { %p3471_p9 = pnand %p3470_p8, %p3464_p5 }
  0x33   :  { %3474 = shalt.err (!%p3471_p9)
}
  0x34   :  { %57 = dma.hbm_to_vmem [thread:$0]  %s4129_s4, 512, %s52_s15, [#allocation8], %s3529_s21, %s3529_s21, %s3530_s22  }
  0x35   :  { %s3475_s30 = scalar_lea.hbm %s4130_s5, 512 }
  0x36   :  { %p3476_p10 = scmp.ne.s32.totalorder %s4130_s5, %s3475_s30  ;;  %p3479_p11 = scmp.lt.u32.totalorder %s3475_s30, %s4130_s5 }
  0x38   :  { %p3481_p12 = pnand %p3479_p11, %p3476_p10 }
  0x3a   :  { %3484 = shalt.err (!%p3481_p12)
}
  0x3b   :  { %s3485_s14 = scalar_lea.vmem %s3626_s17, 512  ;;  %p3490_p0 = scmp.lt.s32.totalorder %s3626_s17, %s3626_s17 }
  0x3c   :  { %p3486_p13 = scmp.ne.s32.totalorder %s3626_s17, %s3485_s14  ;;  %p3491_p1 = scmp.lt.s32.totalorder %s3485_s14, %s3485_s14 }
  0x3e   :  { %p3492_p2 = por %p3491_p1, %p3490_p0 }
  0x40   :  { %p3493_p3 = pnand %p3492_p2, %p3486_p13 }
  0x42   :  { %3496 = shalt.err (!%p3493_p3)
}
  0x43   :  { %69 = dma.hbm_to_vmem [thread:$0]  %s4130_s5, 512, %s3626_s17, [#allocation11], %s3529_s21, %s3529_s21, %s3530_s22  }
  0x44   :  { %3519 = dma.done.wait [#allocation5], 256  }
  0x45   :  { %3520 = vsyncadd [#allocation5], 4294967040 }
  0x46   :  { %3521 = dma.done.wait [#allocation8], 768  }
  0x47   :  { %3522 = vsyncadd [#allocation8], 4294966528 }
  0x48   :  { %3523 = dma.done.wait [#allocation11], 512  }
  0x49   :  { %3524 = vsyncadd [#allocation11], 4294966784  ;;  %v3533_v0 = vmov 0.0|0.0   ;;  %vm3534_vm0 = vmmov 0   ;;  %v3535_v1 = vmov 0.0   ;;  %vm103_vm1 = vcmask 130048  }
  0x4a   :  { %3029 = vmatprep.subr.bf16.mxu1 %v3533_v0  ;;  %2835 = vmatprep.mubr.msk.f32.mxu1 %vm3534_vm0, %v3535_v1  ;;  %v90_v2 = vld [vmem:[#allocation7] sm:$0xff]  ;;  %v91_v3 = vld [vmem:[#allocation7 + $0x8] sm:$0xff]  ;;  %v88_v4 = vld [vmem:[#allocation4] sm:$0xff]  ;;  %s3536_s26 = smov 64   ;;  %vm331_vm2 = vcmask 1041409   ;;  %vm189_vm3 = vcmask 261120  }
  0x4b   :  { %v3025_v5 = vpack.c.bf16 %v91_v3, %v90_v2  ;;  %2824 = vmatprep.mubr.msk.f32.mxu0 %vm103_vm1, %v88_v4  ;;  %v92_v6 = vld [vmem:[%s4127_s2] sm:$0xff]  ;;  %v93_v7 = vld [vmem:[%s4127_s2 + $0x8] sm:$0xff]  ;;  %v94_v9 = vld [vmem:[%s4127_s2 + $0x10] sm:$0xff]  ;;  %vm325_vm4 = vcmask 253952   ;;  %s3538_s14 = smov [#allocation12]   ;;  %vm2647_vm5 = vcmask 64512  }
  0x4c   :  { %v3673_v8 = vpack.c.bf16 %v93_v7, %v92_v6  ;;  %v95_v10 = vld [vmem:[%s4127_s2 + $0x18] sm:$0xff]  ;;  %v89_v11 = vld [vmem:[#allocation4 + $0x8] sm:$0xff]  ;;  %v2669_v13 = vld [vmem:[%s4128_s3] ss:$0 sm:$0xff]  ;;  %s3537_s3 = smov 32   ;;  %s2655_s4 = sshll.u32 %s3538_s14, 4  ;;  %s2656_s4 = int_to_ptr.vmem [resolvable:$true] %s2655_s4 }
  0x4d   :  { %3026 = vmatprep.subr.bf16.mxu0 %v3025_v5  ;;  %v3682_v12 = vpack.c.bf16 %v95_v10, %v94_v9  ;;  %s3497_s15 = scalar_lea.vmem %s2656_s4, 256  ;;  %p3502_p5 = scmp.lt.s32.totalorder %s2656_s4, %s2656_s4 }
  0x4e   :  { %3028 = vmatpush3.bf16.msra.mxu0 %v3025_v5  ;;  %3031 = vmatpush3.bf16.msra.mxu1 %v3673_v8  ;;  %p3498_p4 = scmp.ne.s32.totalorder %s2656_s4, %s3497_s15  ;;  %p3503_p6 = scmp.lt.s32.totalorder %s3497_s15, %s3497_s15 }
  0x4f   :  { %3032 = vmatprep.subr.bf16.mxu1 %v3533_v0  ;;  %3035 = vmatprep.subr.bf16.mxu0 %v3533_v0 }
  0x50   :  { %p3504_p7 = por %p3503_p6, %p3502_p5 }
  0x51   :  { %2825 = vmatmul.mubr.msk.f32.vlgmr.msra.gmra.mrb[0].mxu0 %vm103_vm1, %v89_v11 }
  0x52   :  { %3034 = vmatpush3.bf16.msra.mxu1 %v3682_v12  ;;  %3037 = vmatpush3.bf16.msra.mxu0 %v3673_v8  ;;  %p3505_p8 = pnand %p3504_p7, %p3498_p4 }
  0x53   :  { %3038 = vmatprep.subr.bf16.mxu0 %v3533_v0  ;;  %2846 = vmatprep.mubr.msk.f32.mxu0 %vm3534_vm0, %v3535_v1 }
  0x54   :  { %3041 = vmatprep.subr.bf16.mxu1 %v3533_v0 }
  0x55   :  { %2836 = vmatmul.mubr.f32.vlgmr.msra.gmra.mrb[0].mxu1 %v3535_v1 }
  0x56   :  { %3040 = vmatpush3.bf16.msra.mxu0 %v3682_v12  ;;  %3043 = vmatpush3.bf16.msra.mxu1 %v3673_v8 }
  0x57   :  { %3044 = vmatprep.subr.bf16.mxu1 %v3533_v0  ;;  %2857 = vmatprep.mubr.msk.f32.mxu1 %vm3534_vm0, %v3535_v1 }
  0x58   :  { %3047 = vmatprep.subr.bf16.mxu0 %v3533_v0 }
  0x5a   :  { %3046 = vmatpush3.bf16.msra.mxu1 %v3682_v12 }
  0x5b   :  { %3053 = vmatprep.subr.bf16.mxu1 %v3533_v0 }
 0x124   :  { %v2826_v14 = vpop.f32.mrb[0].mxu0 }
 0x125   :  { %v182_v15 = vadd.f32 %v2826_v14, %v2669_v13  ;;  %v176_v16 = vpop.f32.mrb[1].mxu0 }
 0x126   :  { %v177_v17 = vadd.f32 %v2669_v13, %v176_v16 }
 0x127   :  { %186 = vst [vmem:[#allocation2 + $0x8] sm:$0xff] %v182_v15 }
 0x128   :  { %185 = vst [vmem:[#allocation2] sm:$0xff] %v177_v17  ;;  %v259_v18 = vpop.f32.mrb[0].mxu1 }
 0x129   :  { %v2837_v19 = vpop.f32.mrb[1].mxu1  ;;  %v264_v20 = vrot.slane %v259_v18, 1 }
 0x12e   :  { %v188_v21 = vld [vmem:[#allocation2 + $0x8] sm:$0x1]  ;;  %v329_v59 = vld [vmem:[#allocation2 + $0x9] sm:$0x1] }
 0x12f   :  { %v187_v22 = vld [vmem:[#allocation2] sm:$0x1]  ;;  %v268_v23 = vadd.f32 %v264_v20, %v188_v21  ;;  %v328_v54 = vld [vmem:[#allocation2 + $0x1] sm:$0x1] }
 0x130   :  { %v267_v24 = vadd.f32 %v259_v18, %v187_v22 }
 0x131   :  { %3153 = vtanh.f32 %v268_v23  ;;  %v2673_v27 = vmul.f32 -1.442695, %v268_v23 }
 0x132   :  { %3155 = vtanh.f32 %v267_v24  ;;  %v2672_v28 = vmul.f32 -1.442695, %v267_v24 }
 0x133   :  { %3157 = vpow2.f32 %v2673_v27 }
 0x134   :  { %3159 = vpow2.f32 %v2672_v28 }
 0x13b   :  { %v3154_v25 = vpop.eup %3153 }
 0x13c   :  { %289 = vrot.lane.b32.xlu0 %v3154_v25, %s3536_s26  ;;  %v3156_v26 = vpop.eup %3155 }
 0x13d   :  { %v3158_v29 = vpop.eup %3157 }
 0x13e   :  { %v276_v30 = vadd.f32 1.0, %v3158_v29  ;;  %v3160_v31 = vpop.eup %3159 }
 0x13f   :  { %v275_v32 = vadd.f32 1.0, %v3160_v31 }
 0x140   :  { %287 = vrot.lane.b32.xlu0 %v3156_v26, %s3536_s26  ;;  %3161 = vrcp.f32 %v276_v30  ;;  %v471_v30 = vld [vmem:[#allocation2 + $0x2] sm:$0x1] }
 0x141   :  { %3163 = vrcp.f32 %v275_v32 }
 0x14a   :  { %v3162_v33 = vpop.eup %3161 }
 0x14b   :  { %v3164_v36 = vpop.eup %3163  ;;  %v284_v39 = vmul.f32 0.0, %v3162_v33 }
 0x14c   :  { %v283_v42 = vmul.f32 0.0, %v3164_v36 }
 0x1ae   :  { %v290_v34 = vpop.permute.xlu0 %289 }
 0x1af   :  { %v294_v35 = vmul.f32 %v3162_v33, %v290_v34 }
 0x1b1   :  { %299 = vrot.lane.b32.xlu1 %v294_v35, %s3537_s3  ;;  %v472_v35 = vld [vmem:[#allocation2 + $0xa] sm:$0x1] }
 0x1b2   :  { %v288_v37 = vpop.permute.xlu0 %287 }
 0x1b3   :  { %v293_v38 = vmul.f32 %v3164_v36, %v288_v37 }
 0x1b5   :  { %297 = vrot.lane.b32.xlu1 %v293_v38, %s3537_s3 }
 0x223   :  { %v300_v40 = vpop.permute.xlu1 %299 }
 0x224   :  { %v304_v41 = vadd.f32 %v300_v40, %v284_v39 }
 0x226   :  { %3165 = vtanh.f32 %v304_v41 }
 0x227   :  { %v298_v43 = vpop.permute.xlu1 %297 }
 0x228   :  { %v303_v44 = vadd.f32 %v298_v43, %v283_v42 }
 0x22a   :  { %3167 = vtanh.f32 %v303_v44 }
 0x230   :  { %v3166_v45 = vpop.eup %3165 }
 0x231   :  { %311 = vrot.lane.b32.xlu0 %v3166_v45, %s3536_s26 }
 0x234   :  { %v3168_v46 = vpop.eup %3167 }
 0x235   :  { %309 = vrot.lane.b32.xlu1 %v3168_v46, %s3536_s26 }
 0x2a3   :  { %v312_v47 = vpop.permute.xlu0 %311 }
 0x2a4   :  { %v3711_v48 = vmul.f32 %v3162_v33, %v312_v47 }
 0x2a6   :  { %v330_v50 = vrot.slane %v3711_v48, 7 }
 0x2a7   :  { %v310_v49 = vpop.permute.xlu1 %309 }
 0x2a8   :  { %v3714_v51 = vmul.f32 %v3164_v36, %v310_v49 }
 0x2aa   :  { %v332_v52 = vsel %vm331_vm2, %v330_v50, %v3714_v51 }
 0x2ab   :  { %333 = vrot.lane.b32.xlu0 %v332_v52, %s3537_s3 }
 0x31d   :  { %v334_v53 = vpop.permute.xlu0 %333 }
 0x31e   :  { %2847 = vmatmul.mubr.msk.f32.vlgmr.msra.gmra.mrb[2].mxu0 %vm189_vm3, %v334_v53 }
 0x31f   :  { %3049 = vmatpush3.bf16.msra.mxu0 %v3673_v8  ;;  %2868 = vmatprep.mubr.msk.f32.mxu0 %vm3534_vm0, %v3535_v1 }
 0x320   :  { %3050 = vmatprep.subr.bf16.mxu0 %v3533_v0 }
 0x323   :  { %3052 = vmatpush3.bf16.msra.mxu0 %v3682_v12 }
 0x324   :  { %3059 = vmatprep.subr.bf16.mxu0 %v3533_v0 }
 0x3f1   :  { %v403_v55 = vpop.f32.mrb[2].mxu0 }
 0x3f2   :  { %v408_v56 = vrot.slane %v403_v55, 1  ;;  %v411_v57 = vadd.f32 %v403_v55, %v328_v54  ;;  %v2848_v58 = vpop.f32.mrb[3].mxu0 }
 0x3f4   :  { %v412_v60 = vadd.f32 %v408_v56, %v329_v59  ;;  %3169 = vtanh.f32 %v411_v57  ;;  %v2675_v63 = vmul.f32 -1.442695, %v411_v57 }
 0x3f6   :  { %3171 = vtanh.f32 %v412_v60  ;;  %v2676_v2 = vmul.f32 -1.442695, %v412_v60 }
 0x3f7   :  { %3173 = vpow2.f32 %v2675_v63 }
 0x3f8   :  { %3175 = vpow2.f32 %v2676_v2 }
 0x3fe   :  { %v3170_v61 = vpop.eup %3169 }
 0x3ff   :  { %431 = vrot.lane.b32.xlu0 %v3170_v61, %s3536_s26 }
 0x400   :  { %v3172_v62 = vpop.eup %3171 }
 0x401   :  { %433 = vrot.lane.b32.xlu1 %v3172_v62, %s3536_s26  ;;  %v3174_v3 = vpop.eup %3173 }
 0x402   :  { %v3176_v4 = vpop.eup %3175  ;;  %v419_v5 = vadd.f32 1.0, %v3174_v3 }
 0x403   :  { %v420_v6 = vadd.f32 1.0, %v3176_v4 }
 0x404   :  { %3177 = vrcp.f32 %v419_v5 }
 0x405   :  { %3179 = vrcp.f32 %v420_v6  ;;  %v613_v6 = vld [vmem:[#allocation2 + $0x3] sm:$0x1] }
 0x40e   :  { %v3178_v7 = vpop.eup %3177 }
 0x40f   :  { %v3180_v11 = vpop.eup %3179  ;;  %v427_v15 = vmul.f32 %v3178_v7, %v303_v44 }
 0x410   :  { %v428_v18 = vmul.f32 %v3180_v11, %v304_v41 }
 0x471   :  { %v432_v9 = vpop.permute.xlu0 %431 }
 0x472   :  { %v437_v10 = vmul.f32 %v3178_v7, %v432_v9 }
 0x473   :  { %v434_v13 = vpop.permute.xlu1 %433 }
 0x474   :  { %441 = vrot.lane.b32.xlu0 %v437_v10, %s3537_s3  ;;  %v438_v14 = vmul.f32 %v3180_v11, %v434_v13  ;;  %v614_v13 = vld [vmem:[#allocation2 + $0xb] sm:$0x1] }
 0x476   :  { %443 = vrot.lane.b32.xlu1 %v438_v14, %s3537_s3 }
 0x4e6   :  { %v442_v16 = vpop.permute.xlu0 %441 }
 0x4e7   :  { %v447_v17 = vadd.f32 %v442_v16, %v427_v15 }
 0x4e8   :  { %v444_v19 = vpop.permute.xlu1 %443 }
 0x4e9   :  { %3181 = vtanh.f32 %v447_v17  ;;  %v448_v20 = vadd.f32 %v444_v19, %v428_v18 }
 0x4eb   :  { %3183 = vtanh.f32 %v448_v20 }
 0x4f3   :  { %v3182_v21 = vpop.eup %3181 }
 0x4f4   :  { %453 = vrot.lane.b32.xlu0 %v3182_v21, %s3536_s26 }
 0x4f5   :  { %v3184_v22 = vpop.eup %3183 }
 0x4f6   :  { %455 = vrot.lane.b32.xlu1 %v3184_v22, %s3536_s26 }
 0x566   :  { %v454_v23 = vpop.permute.xlu0 %453 }
 0x567   :  { %v3734_v26 = vmul.f32 %v3178_v7, %v454_v23 }
 0x568   :  { %v456_v24 = vpop.permute.xlu1 %455 }
 0x569   :  { %v3732_v25 = vmul.f32 %v3180_v11, %v456_v24 }
 0x56b   :  { %v473_v27 = vrot.slane %v3732_v25, 7 }
 0x56d   :  { %v474_v28 = vsel %vm331_vm2, %v473_v27, %v3734_v26 }
 0x56e   :  { %475 = vrot.lane.b32.xlu1 %v474_v28, %s3537_s3 }
 0x5e0   :  { %v476_v29 = vpop.permute.xlu1 %475 }
 0x5e1   :  { %2858 = vmatmul.mubr.msk.f32.vlgmr.msra.gmra.mrb[2].mxu1 %vm189_vm3, %v476_v29 }
 0x5e2   :  { %3055 = vmatpush3.bf16.msra.mxu1 %v3673_v8  ;;  %2879 = vmatprep.mubr.msk.f32.mxu1 %vm3534_vm0, %v3535_v1 }
 0x5e3   :  { %3056 = vmatprep.subr.bf16.mxu1 %v3533_v0 }
 0x5e6   :  { %3058 = vmatpush3.bf16.msra.mxu1 %v3682_v12 }
 0x5e7   :  { %3065 = vmatprep.subr.bf16.mxu1 %v3533_v0 }
 0x6b4   :  { %v545_v31 = vpop.f32.mrb[2].mxu1 }
 0x6b5   :  { %v550_v32 = vrot.slane %v545_v31, 1  ;;  %v553_v33 = vadd.f32 %v545_v31, %v471_v30  ;;  %v2859_v34 = vpop.f32.mrb[3].mxu1 }
 0x6b7   :  { %v554_v36 = vadd.f32 %v550_v32, %v472_v35  ;;  %3185 = vtanh.f32 %v553_v33  ;;  %v2678_v39 = vmul.f32 -1.442695, %v553_v33 }
 0x6b9   :  { %3187 = vtanh.f32 %v554_v36  ;;  %v2679_v40 = vmul.f32 -1.442695, %v554_v36 }
 0x6ba   :  { %3189 = vpow2.f32 %v2678_v39 }
 0x6bb   :  { %3191 = vpow2.f32 %v2679_v40 }
 0x6c1   :  { %v3186_v37 = vpop.eup %3185 }
 0x6c2   :  { %573 = vrot.lane.b32.xlu1 %v3186_v37, %s3536_s26 }
 0x6c3   :  { %v3188_v38 = vpop.eup %3187 }
 0x6c4   :  { %575 = vrot.lane.b32.xlu0 %v3188_v38, %s3536_s26  ;;  %v3190_v41 = vpop.eup %3189 }
 0x6c5   :  { %v3192_v42 = vpop.eup %3191  ;;  %v561_v43 = vadd.f32 1.0, %v3190_v41 }
 0x6c6   :  { %v562_v44 = vadd.f32 1.0, %v3192_v42 }
 0x6c7   :  { %3193 = vrcp.f32 %v561_v43 }
 0x6c8   :  { %3195 = vrcp.f32 %v562_v44 }
 0x6d1   :  { %v3194_v45 = vpop.eup %3193 }
 0x6d2   :  { %v3196_v49 = vpop.eup %3195  ;;  %v569_v53 = vmul.f32 %v3194_v45, %v447_v17 }
 0x6d3   :  { %v570_v56 = vmul.f32 %v3196_v49, %v448_v20 }
 0x734   :  { %v574_v46 = vpop.permute.xlu1 %573 }
 0x735   :  { %v579_v47 = vmul.f32 %v3194_v45, %v574_v46  ;;  %v755_v46 = vld [vmem:[#allocation2 + $0x4] sm:$0x1] }
 0x736   :  { %v576_v50 = vpop.permute.xlu0 %575 }
 0x737   :  { %583 = vrot.lane.b32.xlu1 %v579_v47, %s3537_s3  ;;  %v580_v52 = vmul.f32 %v3196_v49, %v576_v50 }
 0x739   :  { %585 = vrot.lane.b32.xlu0 %v580_v52, %s3537_s3 }
 0x7a9   :  { %v584_v54 = vpop.permute.xlu1 %583 }
 0x7aa   :  { %v589_v55 = vadd.f32 %v584_v54, %v569_v53  ;;  %v756_v53 = vld [vmem:[#allocation2 + $0xc] sm:$0x1] }
 0x7ab   :  { %v586_v57 = vpop.permute.xlu0 %585 }
 0x7ac   :  { %3197 = vtanh.f32 %v589_v55  ;;  %v590_v58 = vadd.f32 %v586_v57, %v570_v56 }
 0x7ae   :  { %3199 = vtanh.f32 %v590_v58 }
 0x7b6   :  { %v3198_v59 = vpop.eup %3197 }
 0x7b7   :  { %595 = vrot.lane.b32.xlu1 %v3198_v59, %s3536_s26 }
 0x7b8   :  { %v3200_v60 = vpop.eup %3199 }
 0x7b9   :  { %597 = vrot.lane.b32.xlu0 %v3200_v60, %s3536_s26 }
 0x829   :  { %v596_v61 = vpop.permute.xlu1 %595 }
 0x82a   :  { %v3755_v2 = vmul.f32 %v3194_v45, %v596_v61 }
 0x82b   :  { %v598_v62 = vpop.permute.xlu0 %597 }
 0x82c   :  { %v3753_v63 = vmul.f32 %v3196_v49, %v598_v62 }
 0x82e   :  { %v615_v3 = vrot.slane %v3753_v63, 7 }
 0x830   :  { %v616_v4 = vsel %vm331_vm2, %v615_v3, %v3755_v2 }
 0x831   :  { %617 = vrot.lane.b32.xlu0 %v616_v4, %s3537_s3 }
 0x8a3   :  { %v618_v5 = vpop.permute.xlu0 %617 }
 0x8a4   :  { %2869 = vmatmul.mubr.msk.f32.vlgmr.msra.gmra.mrb[4].mxu0 %vm189_vm3, %v618_v5 }
 0x8a5   :  { %3061 = vmatpush3.bf16.msra.mxu0 %v3673_v8  ;;  %2890 = vmatprep.mubr.msk.f32.mxu0 %vm3534_vm0, %v3535_v1 }
 0x8a6   :  { %3062 = vmatprep.subr.bf16.mxu0 %v3533_v0 }
 0x8a9   :  { %3064 = vmatpush3.bf16.msra.mxu0 %v3682_v12 }
 0x8aa   :  { %3071 = vmatprep.subr.bf16.mxu0 %v3533_v0 }
 0x977   :  { %v687_v7 = vpop.f32.mrb[4].mxu0 }
 0x978   :  { %v692_v9 = vrot.slane %v687_v7, 1  ;;  %v695_v10 = vadd.f32 %v687_v7, %v613_v6  ;;  %v2870_v11 = vpop.f32.mrb[5].mxu0 }
 0x97a   :  { %v696_v14 = vadd.f32 %v692_v9, %v614_v13  ;;  %3201 = vtanh.f32 %v695_v10  ;;  %v2681_v17 = vmul.f32 -1.442695, %v695_v10 }
 0x97c   :  { %3203 = vtanh.f32 %v696_v14  ;;  %v2682_v18 = vmul.f32 -1.442695, %v696_v14 }
 0x97d   :  { %3205 = vpow2.f32 %v2681_v17 }
 0x97e   :  { %3207 = vpow2.f32 %v2682_v18 }
 0x984   :  { %v3202_v15 = vpop.eup %3201 }
 0x985   :  { %715 = vrot.lane.b32.xlu0 %v3202_v15, %s3536_s26 }
 0x986   :  { %v3204_v16 = vpop.eup %3203 }
 0x987   :  { %717 = vrot.lane.b32.xlu1 %v3204_v16, %s3536_s26  ;;  %v3206_v19 = vpop.eup %3205 }
 0x988   :  { %v3208_v20 = vpop.eup %3207  ;;  %v703_v21 = vadd.f32 1.0, %v3206_v19 }
 0x989   :  { %v704_v22 = vadd.f32 1.0, %v3208_v20 }
 0x98a   :  { %3209 = vrcp.f32 %v703_v21 }
 0x98b   :  { %3211 = vrcp.f32 %v704_v22 }
 0x994   :  { %v3210_v23 = vpop.eup %3209 }
 0x995   :  { %v3212_v28 = vpop.eup %3211  ;;  %v711_v31 = vmul.f32 %v3210_v23, %v589_v55 }
 0x996   :  { %v712_v34 = vmul.f32 %v3212_v28, %v590_v58 }
 0x9f7   :  { %v716_v24 = vpop.permute.xlu0 %715 }
 0x9f8   :  { %v721_v27 = vmul.f32 %v3210_v23, %v716_v24 }
 0x9f9   :  { %v718_v29 = vpop.permute.xlu1 %717 }
 0x9fa   :  { %725 = vrot.lane.b32.xlu0 %v721_v27, %s3537_s3  ;;  %v722_v30 = vmul.f32 %v3212_v28, %v718_v29 }
 0x9fc   :  { %727 = vrot.lane.b32.xlu1 %v722_v30, %s3537_s3 }
 0xa6c   :  { %v726_v32 = vpop.permute.xlu0 %725 }
 0xa6d   :  { %v731_v33 = vadd.f32 %v726_v32, %v711_v31 }
 0xa6e   :  { %v728_v35 = vpop.permute.xlu1 %727 }
 0xa6f   :  { %3213 = vtanh.f32 %v731_v33  ;;  %v732_v36 = vadd.f32 %v728_v35, %v712_v34 }
 0xa71   :  { %3215 = vtanh.f32 %v732_v36 }
 0xa79   :  { %v3214_v37 = vpop.eup %3213 }
 0xa7a   :  { %737 = vrot.lane.b32.xlu0 %v3214_v37, %s3536_s26 }
 0xa7b   :  { %v3216_v38 = vpop.eup %3215 }
 0xa7c   :  { %739 = vrot.lane.b32.xlu1 %v3216_v38, %s3536_s26 }
 0xaec   :  { %v738_v39 = vpop.permute.xlu0 %737 }
 0xaed   :  { %v3776_v42 = vmul.f32 %v3210_v23, %v738_v39 }
 0xaee   :  { %v740_v40 = vpop.permute.xlu1 %739 }
 0xaef   :  { %v3774_v41 = vmul.f32 %v3212_v28, %v740_v40  ;;  %v897_v28 = vld [vmem:[#allocation2 + $0x5] sm:$0x1] }
 0xaf1   :  { %v757_v43 = vrot.slane %v3774_v41, 7 }
 0xaf3   :  { %v758_v44 = vsel %vm331_vm2, %v757_v43, %v3776_v42 }
 0xaf4   :  { %759 = vrot.lane.b32.xlu1 %v758_v44, %s3537_s3 }
 0xb66   :  { %v760_v45 = vpop.permute.xlu1 %759 }
 0xb67   :  { %2880 = vmatmul.mubr.msk.f32.vlgmr.msra.gmra.mrb[4].mxu1 %vm189_vm3, %v760_v45 }
 0xb68   :  { %3067 = vmatpush3.bf16.msra.mxu1 %v3673_v8  ;;  %2901 = vmatprep.mubr.msk.f32.mxu1 %vm3534_vm0, %v3535_v1 }
 0xb69   :  { %3068 = vmatprep.subr.bf16.mxu1 %v3533_v0 }
 0xb6c   :  { %3070 = vmatpush3.bf16.msra.mxu1 %v3682_v12 }
 0xc3a   :  { %v829_v47 = vpop.f32.mrb[4].mxu1 }
 0xc3b   :  { %v834_v49 = vrot.slane %v829_v47, 1  ;;  %v837_v50 = vadd.f32 %v829_v47, %v755_v46  ;;  %v2881_v52 = vpop.f32.mrb[5].mxu1 }
 0xc3d   :  { %v838_v54 = vadd.f32 %v834_v49, %v756_v53  ;;  %3217 = vtanh.f32 %v837_v50  ;;  %v2684_v57 = vmul.f32 -1.442695, %v837_v50 }
 0xc3f   :  { %3219 = vtanh.f32 %v838_v54  ;;  %v2685_v58 = vmul.f32 -1.442695, %v838_v54 }
 0xc40   :  { %3221 = vpow2.f32 %v2684_v57 }
 0xc41   :  { %3223 = vpow2.f32 %v2685_v58 }
 0xc47   :  { %v3218_v55 = vpop.eup %3217 }
 0xc48   :  { %857 = vrot.lane.b32.xlu1 %v3218_v55, %s3536_s26 }
 0xc49   :  { %v3220_v56 = vpop.eup %3219 }
 0xc4a   :  { %859 = vrot.lane.b32.xlu0 %v3220_v56, %s3536_s26  ;;  %v3222_v59 = vpop.eup %3221 }
 0xc4b   :  { %v3224_v60 = vpop.eup %3223  ;;  %v845_v61 = vadd.f32 1.0, %v3222_v59 }
 0xc4c   :  { %v846_v62 = vadd.f32 1.0, %v3224_v60 }
 0xc4d   :  { %3225 = vrcp.f32 %v845_v61 }
 0xc4e   :  { %3227 = vrcp.f32 %v846_v62 }
 0xc57   :  { %v3226_v3 = vpop.eup %3225 }
 0xc58   :  { %v3228_v6 = vpop.eup %3227  ;;  %v853_v10 = vmul.f32 %v3226_v3, %v731_v33  ;;  %v898_v33 = vld [vmem:[#allocation2 + $0xd] sm:$0x1] }
 0xc59   :  { %v854_v14 = vmul.f32 %v3228_v6, %v732_v36 }
 0xcba   :  { %v858_v4 = vpop.permute.xlu1 %857 }
 0xcbb   :  { %v863_v5 = vmul.f32 %v3226_v3, %v858_v4 }
 0xcbc   :  { %v860_v7 = vpop.permute.xlu0 %859 }
 0xcbd   :  { %867 = vrot.lane.b32.xlu1 %v863_v5, %s3537_s3  ;;  %v864_v9 = vmul.f32 %v3228_v6, %v860_v7 }
 0xcbf   :  { %869 = vrot.lane.b32.xlu0 %v864_v9, %s3537_s3 }
 0xd2f   :  { %v868_v11 = vpop.permute.xlu1 %867 }
 0xd30   :  { %v873_v13 = vadd.f32 %v868_v11, %v853_v10 }
 0xd31   :  { %v870_v15 = vpop.permute.xlu0 %869 }
 0xd32   :  { %3229 = vtanh.f32 %v873_v13  ;;  %v874_v16 = vadd.f32 %v870_v15, %v854_v14 }
 0xd34   :  { %3231 = vtanh.f32 %v874_v16 }
 0xd3c   :  { %v3230_v17 = vpop.eup %3229 }
 0xd3d   :  { %879 = vrot.lane.b32.xlu1 %v3230_v17, %s3536_s26 }
 0xd3e   :  { %v3232_v18 = vpop.eup %3231 }
 0xd3f   :  { %881 = vrot.lane.b32.xlu0 %v3232_v18, %s3536_s26 }
 0xdaf   :  { %v880_v19 = vpop.permute.xlu1 %879 }
 0xdb0   :  { %v3796_v22 = vmul.f32 %v3226_v3, %v880_v19 }
 0xdb1   :  { %v882_v20 = vpop.permute.xlu0 %881 }
 0xdb2   :  { %v3794_v21 = vmul.f32 %v3228_v6, %v882_v20  ;;  %v1039_v6 = vld [vmem:[#allocation2 + $0x6] sm:$0x1] }
 0xdb4   :  { %v899_v23 = vrot.slane %v3794_v21, 7 }
 0xdb6   :  { %v900_v24 = vsel %vm331_vm2, %v899_v23, %v3796_v22 }
 0xdb7   :  { %901 = vrot.lane.b32.xlu0 %v900_v24, %s3537_s3 }
 0xe29   :  { %v902_v27 = vpop.permute.xlu0 %901 }
 0xe2a   :  { %2891 = vmatmul.mubr.msk.f32.vlgmr.msra.gmra.mrb[6].mxu0 %vm189_vm3, %v902_v27 }
 0xe2b   :  { %3073 = vmatpush3.bf16.msra.mxu0 %v3673_v8  ;;  %2912 = vmatprep.mubr.msk.f32.mxu0 %vm3534_vm0, %v3535_v1 }
 0xe2c   :  { %3074 = vmatprep.subr.bf16.mxu0 %v3533_v0 }
 0xe2f   :  { %3076 = vmatpush3.bf16.msra.mxu0 %v3682_v12 }
 0xe30   :  { %3085 = vmatprep.subr.bf16.mxu0 %v3533_v0 }
 0xefd   :  { %v971_v29 = vpop.f32.mrb[6].mxu0 }
 0xefe   :  { %v976_v30 = vrot.slane %v971_v29, 1  ;;  %v979_v31 = vadd.f32 %v971_v29, %v897_v28  ;;  %v2892_v32 = vpop.f32.mrb[7].mxu0 }
 0xf00   :  { %v980_v34 = vadd.f32 %v976_v30, %v898_v33  ;;  %3233 = vtanh.f32 %v979_v31  ;;  %v2687_v36 = vmul.f32 -1.442695, %v979_v31 }
 0xf02   :  { %3235 = vtanh.f32 %v980_v34  ;;  %v2688_v37 = vmul.f32 -1.442695, %v980_v34 }
 0xf03   :  { %3237 = vpow2.f32 %v2687_v36 }
 0xf04   :  { %3239 = vpow2.f32 %v2688_v37 }
 0xf0a   :  { %v3234_v35 = vpop.eup %3233 }
 0xf0b   :  { %999 = vrot.lane.b32.xlu0 %v3234_v35, %s3536_s26 }
 0xf0c   :  { %v3236_v8 = vpop.eup %3235 }
 0xf0d   :  { %1001 = vrot.lane.b32.xlu1 %v3236_v8, %s3536_s26  ;;  %v3238_v12 = vpop.eup %3237 }
 0xf0e   :  { %v3240_v38 = vpop.eup %3239  ;;  %v987_v39 = vadd.f32 1.0, %v3238_v12 }
 0xf0f   :  { %v988_v40 = vadd.f32 1.0, %v3240_v38 }
 0xf10   :  { %3241 = vrcp.f32 %v987_v39 }
 0xf11   :  { %3243 = vrcp.f32 %v988_v40 }
 0xf1a   :  { %v3242_v43 = vpop.eup %3241 }
 0xf1b   :  { %v3244_v46 = vpop.eup %3243  ;;  %v995_v50 = vmul.f32 %v3242_v43, %v873_v13  ;;  %v1040_v13 = vld [vmem:[#allocation2 + $0xe] sm:$0x1] }
 0xf1c   :  { %v996_v54 = vmul.f32 %v3244_v46, %v874_v16 }
 0xf7d   :  { %v1000_v44 = vpop.permute.xlu0 %999 }
 0xf7e   :  { %v1005_v45 = vmul.f32 %v3242_v43, %v1000_v44 }
 0xf7f   :  { %v1002_v47 = vpop.permute.xlu1 %1001 }
 0xf80   :  { %1009 = vrot.lane.b32.xlu0 %v1005_v45, %s3537_s3  ;;  %v1006_v49 = vmul.f32 %v3244_v46, %v1002_v47 }
 0xf82   :  { %1011 = vrot.lane.b32.xlu1 %v1006_v49, %s3537_s3  ;;  %v1181_v49 = vld [vmem:[#allocation2 + $0x7] sm:$0x1] }
 0xff2   :  { %v1010_v52 = vpop.permute.xlu0 %1009 }
 0xff3   :  { %v1015_v53 = vadd.f32 %v1010_v52, %v995_v50 }
 0xff4   :  { %v1012_v55 = vpop.permute.xlu1 %1011 }
 0xff5   :  { %3245 = vtanh.f32 %v1015_v53  ;;  %v1016_v56 = vadd.f32 %v1012_v55, %v996_v54  ;;  %v1182_v55 = vld [vmem:[#allocation2 + $0xf] sm:$0x1] }
 0xff7   :  { %3247 = vtanh.f32 %v1016_v56 }
 0xfff   :  { %v3246_v57 = vpop.eup %3245 }
0x1000   :  { %1021 = vrot.lane.b32.xlu0 %v3246_v57, %s3536_s26 }
0x1001   :  { %v3248_v58 = vpop.eup %3247 }
0x1002   :  { %1023 = vrot.lane.b32.xlu1 %v3248_v58, %s3536_s26 }
0x1072   :  { %v1022_v59 = vpop.permute.xlu0 %1021 }
0x1073   :  { %v3817_v62 = vmul.f32 %v3242_v43, %v1022_v59 }
0x1074   :  { %v1024_v60 = vpop.permute.xlu1 %1023 }
0x1075   :  { %v3815_v61 = vmul.f32 %v3244_v46, %v1024_v60 }
0x1077   :  { %v1041_v3 = vrot.slane %v3815_v61, 7 }
0x1079   :  { %v1042_v4 = vsel %vm331_vm2, %v1041_v3, %v3817_v62 }
0x107a   :  { %1043 = vrot.lane.b32.xlu1 %v1042_v4, %s3537_s3 }
0x10ec   :  { %v1044_v5 = vpop.permute.xlu1 %1043 }
0x10ed   :  { %2902 = vmatmul.mubr.msk.f32.vlgmr.msra.gmra.mrb[6].mxu1 %vm189_vm3, %v1044_v5 }
0x11c0   :  { %v1113_v7 = vpop.f32.mrb[6].mxu1 }
0x11c1   :  { %v1118_v9 = vrot.slane %v1113_v7, 1  ;;  %v1121_v10 = vadd.f32 %v1113_v7, %v1039_v6  ;;  %v2903_v11 = vpop.f32.mrb[7].mxu1 }
0x11c3   :  { %v1122_v14 = vadd.f32 %v1118_v9, %v1040_v13  ;;  %3249 = vtanh.f32 %v1121_v10  ;;  %v2690_v17 = vmul.f32 -1.442695, %v1121_v10 }
0x11c5   :  { %3251 = vtanh.f32 %v1122_v14  ;;  %v2691_v18 = vmul.f32 -1.442695, %v1122_v14 }
0x11c6   :  { %3253 = vpow2.f32 %v2690_v17 }
0x11c7   :  { %3255 = vpow2.f32 %v2691_v18 }
0x11cd   :  { %v3250_v15 = vpop.eup %3249 }
0x11ce   :  { %1141 = vrot.lane.b32.xlu1 %v3250_v15, %s3536_s26 }
0x11cf   :  { %v3252_v16 = vpop.eup %3251 }
0x11d0   :  { %1143 = vrot.lane.b32.xlu0 %v3252_v16, %s3536_s26  ;;  %v3254_v19 = vpop.eup %3253 }
0x11d1   :  { %v3256_v20 = vpop.eup %3255  ;;  %v1129_v23 = vadd.f32 1.0, %v3254_v19 }
0x11d2   :  { %v1130_v24 = vadd.f32 1.0, %v3256_v20 }
0x11d3   :  { %3257 = vrcp.f32 %v1129_v23 }
0x11d4   :  { %3259 = vrcp.f32 %v1130_v24 }
0x11dd   :  { %v3258_v27 = vpop.eup %3257 }
0x11de   :  { %v3260_v30 = vpop.eup %3259  ;;  %v1137_v33 = vmul.f32 %v3258_v27, %v1015_v53 }
0x11df   :  { %v1138_v8 = vmul.f32 %v3260_v30, %v1016_v56 }
0x1240   :  { %v1142_v28 = vpop.permute.xlu1 %1141 }
0x1241   :  { %v1147_v29 = vmul.f32 %v3258_v27, %v1142_v28 }
0x1242   :  { %v1144_v31 = vpop.permute.xlu0 %1143 }
0x1243   :  { %1151 = vrot.lane.b32.xlu1 %v1147_v29, %s3537_s3  ;;  %v1148_v32 = vmul.f32 %v3260_v30, %v1144_v31 }
0x1245   :  { %1153 = vrot.lane.b32.xlu0 %v1148_v32, %s3537_s3 }
0x12b5   :  { %v1152_v34 = vpop.permute.xlu1 %1151 }
0x12b6   :  { %v1157_v35 = vadd.f32 %v1152_v34, %v1137_v33 }
0x12b7   :  { %v1154_v36 = vpop.permute.xlu0 %1153 }
0x12b8   :  { %3261 = vtanh.f32 %v1157_v35  ;;  %v1158_v37 = vadd.f32 %v1154_v36, %v1138_v8 }
0x12ba   :  { %3263 = vtanh.f32 %v1158_v37 }
0x12c2   :  { %v3262_v12 = vpop.eup %3261 }
0x12c3   :  { %1163 = vrot.lane.b32.xlu1 %v3262_v12, %s3536_s26 }
0x12c4   :  { %v3264_v38 = vpop.eup %3263 }
0x12c5   :  { %1165 = vrot.lane.b32.xlu0 %v3264_v38, %s3536_s26 }
0x1335   :  { %v1164_v39 = vpop.permute.xlu1 %1163 }
0x1336   :  { %v1169_v44 = vmul.f32 %v3258_v27, %v1164_v39  ;;  %v1332_v27 = vld [vmem:[#allocation10 + $0x18] sm:$0xff] }
0x1337   :  { %v1166_v40 = vpop.permute.xlu0 %1165 }
0x1338   :  { %v3830_v43 = vmul.f32 %v3260_v30, %v1166_v40 }
0x133a   :  { %v1183_v45 = vrot.slane %v3830_v43, 7 }
0x133c   :  { %v1184_v46 = vsel %vm331_vm2, %v1183_v45, %v1169_v44 }
0x133d   :  { %1185 = vrot.lane.b32.xlu0 %v1184_v46, %s3537_s3 }
0x13af   :  { %v1186_v47 = vpop.permute.xlu0 %1185 }
0x13b0   :  { %2913 = vmatmul.mubr.msk.f32.vlgmr.msra.gmra.mrb[8].mxu0 %vm189_vm3, %v1186_v47 }
0x13b1   :  { %2934 = vmatprep.mubr.msk.f32.mxu0 %vm3534_vm0, %v3535_v1 }
0x1483   :  { %v1255_v50 = vpop.f32.mrb[8].mxu0 }
0x1484   :  { %v1260_v52 = vrot.slane %v1255_v50, 1  ;;  %v1263_v53 = vadd.f32 %v1255_v50, %v1181_v49  ;;  %v2914_v54 = vpop.f32.mrb[9].mxu0 }
0x1486   :  { %v1264_v56 = vadd.f32 %v1260_v52, %v1182_v55  ;;  %3265 = vtanh.f32 %v1263_v53  ;;  %v2693_v59 = vmul.f32 -1.442695, %v1263_v53  ;;  %v2695_v53 = vld [vmem:[%s4131_s6] ss:$0 sm:$0xff] }
0x1488   :  { %3267 = vtanh.f32 %v1264_v56  ;;  %v2694_v60 = vmul.f32 -1.442695, %v1264_v56 }
0x1489   :  { %3269 = vpow2.f32 %v2693_v59 }
0x148a   :  { %3271 = vpow2.f32 %v2694_v60 }
0x1490   :  { %v3266_v57 = vpop.eup %3265 }
0x1491   :  { %1283 = vrot.lane.b32.xlu1 %v3266_v57, %s3536_s26 }
0x1492   :  { %v3268_v58 = vpop.eup %3267 }
0x1493   :  { %1285 = vrot.lane.b32.xlu0 %v3268_v58, %s3536_s26  ;;  %v3270_v3 = vpop.eup %3269 }
0x1494   :  { %v3272_v4 = vpop.eup %3271  ;;  %v1271_v5 = vadd.f32 1.0, %v3270_v3 }
0x1495   :  { %v1272_v6 = vadd.f32 1.0, %v3272_v4 }
0x1496   :  { %3273 = vrcp.f32 %v1271_v5 }
0x1497   :  { %3275 = vrcp.f32 %v1272_v6 }
0x14a0   :  { %v3274_v7 = vpop.eup %3273 }
0x14a1   :  { %v3276_v11 = vpop.eup %3275  ;;  %v1279_v15 = vmul.f32 %v3274_v7, %v1157_v35 }
0x14a2   :  { %v1280_v18 = vmul.f32 %v3276_v11, %v1158_v37 }
0x1503   :  { %v1284_v9 = vpop.permute.xlu1 %1283 }
0x1504   :  { %v1289_v10 = vmul.f32 %v3274_v7, %v1284_v9 }
0x1505   :  { %v1286_v13 = vpop.permute.xlu0 %1285 }
0x1506   :  { %1293 = vrot.lane.b32.xlu1 %v1289_v10, %s3537_s3  ;;  %v1290_v14 = vmul.f32 %v3276_v11, %v1286_v13 }
0x1508   :  { %1295 = vrot.lane.b32.xlu0 %v1290_v14, %s3537_s3 }
0x1578   :  { %v1294_v16 = vpop.permute.xlu1 %1293 }
0x1579   :  { %v1299_v17 = vadd.f32 %v1294_v16, %v1279_v15 }
0x157a   :  { %v1296_v19 = vpop.permute.xlu0 %1295 }
0x157b   :  { %3277 = vtanh.f32 %v1299_v17  ;;  %v1300_v20 = vadd.f32 %v1296_v19, %v1280_v18 }
0x157d   :  { %3279 = vtanh.f32 %v1300_v20 }
0x1585   :  { %v3278_v23 = vpop.eup %3277 }
0x1586   :  { %1305 = vrot.lane.b32.xlu1 %v3278_v23, %s3536_s26 }
0x1587   :  { %v3280_v24 = vpop.eup %3279 }
0x1588   :  { %1307 = vrot.lane.b32.xlu0 %v3280_v24, %s3536_s26 }
0x158a   :  { %319 = vrot.lane.b32.xlu1 %v3714_v51, %s3537_s3  ;;  %v1325_v51 = vld [vmem:[#allocation9] sm:$0xff] }
0x158c   :  { %463 = vrot.lane.b32.xlu0 %v3734_v26, %s3537_s3 }
0x158e   :  { %605 = vrot.lane.b32.xlu1 %v3755_v2, %s3537_s3  ;;  %v1327_v2 = vld [vmem:[#allocation9 + $0x10] sm:$0xff] }
0x1590   :  { %747 = vrot.lane.b32.xlu0 %v3776_v42, %s3537_s3 }
0x1592   :  { %889 = vrot.lane.b32.xlu1 %v3796_v22, %s3537_s3  ;;  %v1330_v22 = vld [vmem:[#allocation10 + $0x8] sm:$0xff] }
0x1594   :  { %1031 = vrot.lane.b32.xlu0 %v3817_v62, %s3537_s3 }
0x1596   :  { %1173 = vrot.lane.b32.xlu1 %v1169_v44, %s3537_s3 }
0x1598   :  { %465 = vrot.lane.b32.xlu0 %v3732_v25, %s3537_s3  ;;  %v1326_v25 = vld [vmem:[#allocation9 + $0x8] sm:$0xff] }
0x1599   :  { %v3077_v26 = vpack.c.bf16 %v1326_v25, %v1325_v51 }
0x159a   :  { %321 = vrot.lane.b32.xlu1 %v3711_v48, %s3537_s3  ;;  %v1328_v48 = vld [vmem:[#allocation9 + $0x18] sm:$0xff] }
0x159b   :  { %3078 = vmatprep.subr.bf16.mxu1 %v3077_v26  ;;  %v3081_v42 = vpack.c.bf16 %v1328_v48, %v1327_v2 }
0x159c   :  { %749 = vrot.lane.b32.xlu0 %v3774_v41, %s3537_s3  ;;  %3080 = vmatpush3.bf16.msra.mxu1 %v3077_v26 }
0x159d   :  { %3082 = vmatprep.subr.bf16.mxu1 %v3081_v42 }
0x159e   :  { %607 = vrot.lane.b32.xlu1 %v3753_v63, %s3537_s3  ;;  %v1329_v63 = vld [vmem:[#allocation10] sm:$0xff] }
0x159f   :  { %v3871_v62 = vpack.c.bf16 %v1330_v22, %v1329_v63 }
0x15a0   :  { %1033 = vrot.lane.b32.xlu0 %v3815_v61, %s3537_s3  ;;  %3084 = vmatpush3.bf16.msra.mxu1 %v3081_v42 }
0x15a1   :  { %3091 = vmatprep.subr.bf16.mxu1 %v3533_v0  ;;  %3087 = vmatpush3.bf16.msra.mxu0 %v3871_v62 }
0x15a2   :  { %891 = vrot.lane.b32.xlu1 %v3794_v21, %s3537_s3  ;;  %v1331_v21 = vld [vmem:[#allocation10 + $0x10] sm:$0xff]  ;;  %3088 = vmatprep.subr.bf16.mxu0 %v3533_v0 }
0x15a3   :  { %v3876_v29 = vpack.c.bf16 %v1332_v27, %v1331_v21 }
0x15a5   :  { %3090 = vmatpush3.bf16.msra.mxu0 %v3876_v29 }
0x15a6   :  { %1175 = vrot.lane.b32.xlu1 %v3830_v43, %s3537_s3  ;;  %3097 = vmatprep.subr.bf16.mxu0 %v3533_v0 }
0x15a8   :  { %2935 = vmatmul.mubr.f32.vlgmr.msra.gmra.mrb[10].mxu0 %v3535_v1 }
0x15a9   :  { %3099 = vmatpush3.bf16.msra.mxu0 %v3871_v62  ;;  %2956 = vmatprep.mubr.msk.f32.mxu0 %vm3534_vm0, %v3535_v1 }
0x15aa   :  { %3100 = vmatprep.subr.bf16.mxu0 %v3533_v0 }
0x15ad   :  { %3102 = vmatpush3.bf16.msra.mxu0 %v3876_v29 }
0x15ae   :  { %3109 = vmatprep.subr.bf16.mxu0 %v3533_v0 }
0x15f8   :  { %v1306_v41 = vpop.permute.xlu1 %1305 }
0x15f9   :  { %v1311_v61 = vmul.f32 %v3274_v7, %v1306_v41 }
0x15fa   :  { %v1308_v28 = vpop.permute.xlu0 %1307 }
0x15fb   :  { %1315 = vrot.lane.b32.xlu0 %v1311_v61, %s3537_s3  ;;  %v1312_v31 = vmul.f32 %v3276_v11, %v1308_v28 }
0x15fc   :  { %v320_v30 = vpop.permute.xlu1 %319 }
0x15fd   :  { %326 = vst.msk [vmem:[#allocation3] sm:$0x1] %vm325_vm4, %v320_v30 }
0x15fe   :  { %v464_v32 = vpop.permute.xlu0 %463 }
0x15ff   :  { %1317 = vrot.lane.b32.xlu0 %v1312_v31, %s3537_s3  ;;  %469 = vst.msk [vmem:[#allocation3 + $0x1] sm:$0x1] %vm325_vm4, %v464_v32 }
0x1600   :  { %v606_v33 = vpop.permute.xlu1 %605 }
0x1601   :  { %611 = vst.msk [vmem:[#allocation3 + $0x2] sm:$0x1] %vm325_vm4, %v606_v33 }
0x1602   :  { %v748_v34 = vpop.permute.xlu0 %747 }
0x1603   :  { %753 = vst.msk [vmem:[#allocation3 + $0x3] sm:$0x1] %vm325_vm4, %v748_v34 }
0x1604   :  { %v890_v35 = vpop.permute.xlu1 %889 }
0x1605   :  { %895 = vst.msk [vmem:[#allocation3 + $0x4] sm:$0x1] %vm325_vm4, %v890_v35 }
0x1606   :  { %v1032_v8 = vpop.permute.xlu0 %1031 }
0x1607   :  { %1037 = vst.msk [vmem:[#allocation3 + $0x5] sm:$0x1] %vm325_vm4, %v1032_v8 }
0x1608   :  { %v1174_v36 = vpop.permute.xlu1 %1173 }
0x1609   :  { %1179 = vst.msk [vmem:[#allocation3 + $0x6] sm:$0x1] %vm325_vm4, %v1174_v36 }
0x160a   :  { %v466_v37 = vpop.permute.xlu0 %465 }
0x160b   :  { %470 = vst.msk [vmem:[#allocation3 + $0x9] sm:$0x1] %vm325_vm4, %v466_v37 }
0x160c   :  { %v322_v12 = vpop.permute.xlu1 %321 }
0x160d   :  { %327 = vst.msk [vmem:[#allocation3 + $0x8] sm:$0x1] %vm325_vm4, %v322_v12 }
0x160e   :  { %v750_v38 = vpop.permute.xlu0 %749 }
0x160f   :  { %754 = vst.msk [vmem:[#allocation3 + $0xb] sm:$0x1] %vm325_vm4, %v750_v38 }
0x1610   :  { %v608_v39 = vpop.permute.xlu1 %607 }
0x1611   :  { %612 = vst.msk [vmem:[#allocation3 + $0xa] sm:$0x1] %vm325_vm4, %v608_v39 }
0x1612   :  { %v1034_v40 = vpop.permute.xlu0 %1033 }
0x1613   :  { %1038 = vst.msk [vmem:[#allocation3 + $0xd] sm:$0x1] %vm325_vm4, %v1034_v40 }
0x1614   :  { %v892_v43 = vpop.permute.xlu1 %891 }
0x1615   :  { %896 = vst.msk [vmem:[#allocation3 + $0xc] sm:$0x1] %vm325_vm4, %v892_v43 }
0x1618   :  { %v1176_v44 = vpop.permute.xlu1 %1175 }
0x1619   :  { %1180 = vst.msk [vmem:[#allocation3 + $0xe] sm:$0x1] %vm325_vm4, %v1176_v44 }
0x166d   :  { %v1316_v45 = vpop.permute.xlu0 %1315 }
0x166e   :  { %1321 = vst.msk [vmem:[#allocation3 + $0x7] sm:$0x1] %vm325_vm4, %v1316_v45 }
0x1671   :  { %v1318_v46 = vpop.permute.xlu0 %1317 }
0x1672   :  { %1322 = vst.msk [vmem:[#allocation3 + $0xf] sm:$0x1] %vm325_vm4, %v1318_v46 }
0x1675   :  { %v1323_v47 = vld [vmem:[#allocation3] sm:$0xff] }
0x1676   :  { %2923 = vmatprep.mubr.msk.f32.mxu1 %vm189_vm3, %v1323_v47 }
0x1679   :  { %v1324_v49 = vld [vmem:[#allocation3 + $0x8] sm:$0xff] }
0x167a   :  { %2924 = vmatmul.mubr.msk.f32.vlgmr.msra.gmra.mrb[8].mxu1 %vm189_vm3, %v1324_v49 }
0x167b   :  { %3093 = vmatpush3.bf16.msra.mxu1 %v3871_v62  ;;  %2945 = vmatprep.mubr.msk.f32.mxu1 %vm3534_vm0, %v3535_v1  ;;  %v1491_v50 = vpop.f32.mrb[10].mxu0 }
0x167c   :  { %3094 = vmatprep.subr.bf16.mxu1 %v3533_v0  ;;  %v2936_v52 = vpop.f32.mrb[11].mxu0  ;;  %v1496_v58 = vrot.slane %v1491_v50, 1 }
0x167f   :  { %3096 = vmatpush3.bf16.msra.mxu1 %v3876_v29 }
0x1680   :  { %3103 = vmatprep.subr.bf16.mxu1 %v3533_v0 }
0x174d   :  { %v2925_v54 = vpop.f32.mrb[8].mxu1 }
0x174e   :  { %v1418_v55 = vadd.f32 %v2925_v54, %v2695_v53  ;;  %v1412_v56 = vpop.f32.mrb[9].mxu1 }
0x174f   :  { %v1413_v57 = vadd.f32 %v2695_v53, %v1412_v56 }
0x1750   :  { %1422 = vst [vmem:[#allocation2 + $0x8] sm:$0xff] %v1418_v55 }
0x1751   :  { %1421 = vst [vmem:[#allocation2] sm:$0xff] %v1413_v57 }
0x1757   :  { %v1424_v59 = vld [vmem:[#allocation2 + $0x8] sm:$0x1]  ;;  %v1560_v35 = vld [vmem:[#allocation2 + $0x9] sm:$0x1] }
0x1758   :  { %v1423_v60 = vld [vmem:[#allocation2] sm:$0x1]  ;;  %v1500_v3 = vadd.f32 %v1496_v58, %v1424_v59  ;;  %v1559_v30 = vld [vmem:[#allocation2 + $0x1] sm:$0x1] }
0x1759   :  { %v1499_v4 = vadd.f32 %v1491_v50, %v1423_v60 }
0x175a   :  { %3281 = vtanh.f32 %v1500_v3  ;;  %v2699_v7 = vmul.f32 -1.442695, %v1500_v3 }
0x175b   :  { %3283 = vtanh.f32 %v1499_v4  ;;  %v2698_v9 = vmul.f32 -1.442695, %v1499_v4 }
0x175c   :  { %3285 = vpow2.f32 %v2699_v7 }
0x175d   :  { %3287 = vpow2.f32 %v2698_v9 }
0x1764   :  { %v3282_v5 = vpop.eup %3281 }
0x1765   :  { %v3284_v6 = vpop.eup %3283  ;;  %1521 = vrot.lane.b32.xlu1 %v3282_v5, %s3536_s26 }
0x1766   :  { %1519 = vrot.lane.b32.xlu0 %v3284_v6, %s3536_s26  ;;  %v3286_v10 = vpop.eup %3285 }
0x1767   :  { %v3288_v11 = vpop.eup %3287  ;;  %v1508_v13 = vadd.f32 1.0, %v3286_v10 }
0x1768   :  { %v1507_v14 = vadd.f32 1.0, %v3288_v11  ;;  %v1701_v11 = vld [vmem:[#allocation2 + $0x2] sm:$0x1] }
0x1769   :  { %3289 = vrcp.f32 %v1508_v13 }
0x176a   :  { %3291 = vrcp.f32 %v1507_v14 }
0x1773   :  { %v3290_v15 = vpop.eup %3289 }
0x1774   :  { %v3292_v17 = vpop.eup %3291  ;;  %v1516_v23 = vmul.f32 0.0, %v3290_v15 }
0x1775   :  { %v1515_v51 = vmul.f32 0.0, %v3292_v17 }
0x17d7   :  { %v1522_v16 = vpop.permute.xlu1 %1521 }
0x17d8   :  { %v1526_v18 = vmul.f32 %v3290_v15, %v1522_v16  ;;  %v1520_v19 = vpop.permute.xlu0 %1519 }
0x17d9   :  { %v1525_v20 = vmul.f32 %v3292_v17, %v1520_v19 }
0x17da   :  { %1531 = vrot.lane.b32.xlu1 %v1526_v18, %s3537_s3 }
0x17db   :  { %1529 = vrot.lane.b32.xlu0 %v1525_v20, %s3537_s3 }
0x184c   :  { %v1532_v24 = vpop.permute.xlu1 %1531 }
0x184d   :  { %v1536_v25 = vadd.f32 %v1532_v24, %v1516_v23  ;;  %v1530_v26 = vpop.permute.xlu0 %1529 }
0x184e   :  { %v1535_v2 = vadd.f32 %v1530_v26, %v1515_v51 }
0x184f   :  { %3293 = vtanh.f32 %v1536_v25 }
0x1850   :  { %3295 = vtanh.f32 %v1535_v2 }
0x1859   :  { %v3294_v48 = vpop.eup %3293 }
0x185a   :  { %v3296_v42 = vpop.eup %3295  ;;  %1543 = vrot.lane.b32.xlu1 %v3294_v48, %s3536_s26 }
0x185b   :  { %1541 = vrot.lane.b32.xlu0 %v3296_v42, %s3536_s26 }
0x18cc   :  { %v1544_v41 = vpop.permute.xlu1 %1543 }
0x18cd   :  { %v3922_v63 = vmul.f32 %v3290_v15, %v1544_v41  ;;  %v1542_v22 = vpop.permute.xlu0 %1541 }
0x18ce   :  { %v3924_v61 = vmul.f32 %v3292_v17, %v1542_v22  ;;  %v1702_v17 = vld [vmem:[#allocation2 + $0xa] sm:$0x1] }
0x18cf   :  { %v1561_v21 = vrot.slane %v3922_v63, 7 }
0x18d1   :  { %v1562_v27 = vsel %vm331_vm2, %v1561_v21, %v3924_v61 }
0x18d2   :  { %1563 = vrot.lane.b32.xlu1 %v1562_v27, %s3537_s3 }
0x1944   :  { %v1564_v28 = vpop.permute.xlu1 %1563 }
0x1945   :  { %2946 = vmatmul.mubr.msk.f32.vlgmr.msra.gmra.mrb[10].mxu1 %vm189_vm3, %v1564_v28 }
0x1946   :  { %3105 = vmatpush3.bf16.msra.mxu1 %v3871_v62  ;;  %2967 = vmatprep.mubr.msk.f32.mxu1 %vm3534_vm0, %v3535_v1 }
0x1947   :  { %3106 = vmatprep.subr.bf16.mxu1 %v3533_v0 }
0x194a   :  { %3108 = vmatpush3.bf16.msra.mxu1 %v3876_v29 }
0x194b   :  { %3115 = vmatprep.subr.bf16.mxu1 %v3533_v0 }
0x1a18   :  { %v1633_v31 = vpop.f32.mrb[10].mxu1 }
0x1a19   :  { %v1638_v32 = vrot.slane %v1633_v31, 1  ;;  %v1641_v33 = vadd.f32 %v1633_v31, %v1559_v30  ;;  %v2947_v34 = vpop.f32.mrb[11].mxu1 }
0x1a1b   :  { %v1642_v8 = vadd.f32 %v1638_v32, %v1560_v35  ;;  %3297 = vtanh.f32 %v1641_v33  ;;  %v2701_v12 = vmul.f32 -1.442695, %v1641_v33 }
0x1a1d   :  { %3299 = vtanh.f32 %v1642_v8  ;;  %v2702_v38 = vmul.f32 -1.442695, %v1642_v8 }
0x1a1e   :  { %3301 = vpow2.f32 %v2701_v12 }
0x1a1f   :  { %3303 = vpow2.f32 %v2702_v38 }
0x1a25   :  { %v3298_v36 = vpop.eup %3297 }
0x1a26   :  { %1661 = vrot.lane.b32.xlu1 %v3298_v36, %s3536_s26 }
0x1a27   :  { %v3300_v37 = vpop.eup %3299 }
0x1a28   :  { %1663 = vrot.lane.b32.xlu0 %v3300_v37, %s3536_s26  ;;  %v3302_v39 = vpop.eup %3301 }
0x1a29   :  { %v3304_v40 = vpop.eup %3303  ;;  %v1649_v43 = vadd.f32 1.0, %v3302_v39 }
0x1a2a   :  { %v1650_v44 = vadd.f32 1.0, %v3304_v40 }
0x1a2b   :  { %3305 = vrcp.f32 %v1649_v43 }
0x1a2c   :  { %3307 = vrcp.f32 %v1650_v44  ;;  %v1843_v44 = vld [vmem:[#allocation2 + $0x3] sm:$0x1] }
0x1a35   :  { %v3306_v45 = vpop.eup %3305 }
0x1a36   :  { %v3308_v49 = vpop.eup %3307  ;;  %v1657_v53 = vmul.f32 %v3306_v45, %v1535_v2 }
0x1a37   :  { %v1658_v56 = vmul.f32 %v3308_v49, %v1536_v25 }
0x1a98   :  { %v1662_v46 = vpop.permute.xlu1 %1661 }
0x1a99   :  { %v1667_v47 = vmul.f32 %v3306_v45, %v1662_v46 }
0x1a9a   :  { %v1664_v50 = vpop.permute.xlu0 %1663 }
0x1a9b   :  { %1671 = vrot.lane.b32.xlu1 %v1667_v47, %s3537_s3  ;;  %v1668_v52 = vmul.f32 %v3308_v49, %v1664_v50  ;;  %v1844_v50 = vld [vmem:[#allocation2 + $0xb] sm:$0x1] }
0x1a9d   :  { %1673 = vrot.lane.b32.xlu0 %v1668_v52, %s3537_s3 }
0x1b0d   :  { %v1672_v54 = vpop.permute.xlu1 %1671 }
0x1b0e   :  { %v1677_v55 = vadd.f32 %v1672_v54, %v1657_v53 }
0x1b0f   :  { %v1674_v57 = vpop.permute.xlu0 %1673 }
0x1b10   :  { %3309 = vtanh.f32 %v1677_v55  ;;  %v1678_v58 = vadd.f32 %v1674_v57, %v1658_v56 }
0x1b12   :  { %3311 = vtanh.f32 %v1678_v58 }
0x1b1a   :  { %v3310_v59 = vpop.eup %3309 }
0x1b1b   :  { %1683 = vrot.lane.b32.xlu1 %v3310_v59, %s3536_s26 }
0x1b1c   :  { %v3312_v60 = vpop.eup %3311 }
0x1b1d   :  { %1685 = vrot.lane.b32.xlu0 %v3312_v60, %s3536_s26 }
0x1b8d   :  { %v1684_v3 = vpop.permute.xlu1 %1683 }
0x1b8e   :  { %v3945_v6 = vmul.f32 %v3306_v45, %v1684_v3 }
0x1b8f   :  { %v1686_v4 = vpop.permute.xlu0 %1685 }
0x1b90   :  { %v3943_v5 = vmul.f32 %v3308_v49, %v1686_v4 }
0x1b92   :  { %v1703_v7 = vrot.slane %v3943_v5, 7 }
0x1b94   :  { %v1704_v9 = vsel %vm331_vm2, %v1703_v7, %v3945_v6 }
0x1b95   :  { %1705 = vrot.lane.b32.xlu0 %v1704_v9, %s3537_s3 }
0x1c07   :  { %v1706_v10 = vpop.permute.xlu0 %1705 }
0x1c08   :  { %2957 = vmatmul.mubr.msk.f32.vlgmr.msra.gmra.mrb[12].mxu0 %vm189_vm3, %v1706_v10 }
0x1c09   :  { %3111 = vmatpush3.bf16.msra.mxu0 %v3871_v62  ;;  %2978 = vmatprep.mubr.msk.f32.mxu0 %vm3534_vm0, %v3535_v1 }
0x1c0a   :  { %3112 = vmatprep.subr.bf16.mxu0 %v3533_v0 }
0x1c0d   :  { %3114 = vmatpush3.bf16.msra.mxu0 %v3876_v29 }
0x1c0e   :  { %3121 = vmatprep.subr.bf16.mxu0 %v3533_v0 }
0x1cdb   :  { %v1775_v13 = vpop.f32.mrb[12].mxu0 }
0x1cdc   :  { %v1780_v14 = vrot.slane %v1775_v13, 1  ;;  %v1783_v15 = vadd.f32 %v1775_v13, %v1701_v11  ;;  %v2958_v16 = vpop.f32.mrb[13].mxu0 }
0x1cde   :  { %v1784_v18 = vadd.f32 %v1780_v14, %v1702_v17  ;;  %3313 = vtanh.f32 %v1783_v15  ;;  %v2704_v23 = vmul.f32 -1.442695, %v1783_v15 }
0x1ce0   :  { %3315 = vtanh.f32 %v1784_v18  ;;  %v2705_v24 = vmul.f32 -1.442695, %v1784_v18 }
0x1ce1   :  { %3317 = vpow2.f32 %v2704_v23 }
0x1ce2   :  { %3319 = vpow2.f32 %v2705_v24 }
0x1ce8   :  { %v3314_v19 = vpop.eup %3313 }
0x1ce9   :  { %1803 = vrot.lane.b32.xlu0 %v3314_v19, %s3536_s26 }
0x1cea   :  { %v3316_v20 = vpop.eup %3315 }
0x1ceb   :  { %1805 = vrot.lane.b32.xlu1 %v3316_v20, %s3536_s26  ;;  %v3318_v51 = vpop.eup %3317 }
0x1cec   :  { %v3320_v25 = vpop.eup %3319  ;;  %v1791_v26 = vadd.f32 1.0, %v3318_v51 }
0x1ced   :  { %v1792_v2 = vadd.f32 1.0, %v3320_v25 }
0x1cee   :  { %3321 = vrcp.f32 %v1791_v26 }
0x1cef   :  { %3323 = vrcp.f32 %v1792_v2 }
0x1cf8   :  { %v3322_v48 = vpop.eup %3321 }
0x1cf9   :  { %v3324_v22 = vpop.eup %3323  ;;  %v1799_v28 = vmul.f32 %v3322_v48, %v1677_v55 }
0x1cfa   :  { %v1800_v32 = vmul.f32 %v3324_v22, %v1678_v58 }
0x1d5b   :  { %v1804_v42 = vpop.permute.xlu0 %1803 }
0x1d5c   :  { %v1809_v41 = vmul.f32 %v3322_v48, %v1804_v42  ;;  %v1985_v42 = vld [vmem:[#allocation2 + $0x4] sm:$0x1] }
0x1d5d   :  { %v1806_v21 = vpop.permute.xlu1 %1805 }
0x1d5e   :  { %1813 = vrot.lane.b32.xlu0 %v1809_v41, %s3537_s3  ;;  %v1810_v27 = vmul.f32 %v3324_v22, %v1806_v21 }
0x1d60   :  { %1815 = vrot.lane.b32.xlu1 %v1810_v27, %s3537_s3 }
0x1dd0   :  { %v1814_v30 = vpop.permute.xlu0 %1813 }
0x1dd1   :  { %v1819_v31 = vadd.f32 %v1814_v30, %v1799_v28  ;;  %v1986_v28 = vld [vmem:[#allocation2 + $0xc] sm:$0x1] }
0x1dd2   :  { %v1816_v33 = vpop.permute.xlu1 %1815 }
0x1dd3   :  { %3325 = vtanh.f32 %v1819_v31  ;;  %v1820_v34 = vadd.f32 %v1816_v33, %v1800_v32 }
0x1dd5   :  { %3327 = vtanh.f32 %v1820_v34 }
0x1ddd   :  { %v3326_v35 = vpop.eup %3325 }
0x1dde   :  { %1825 = vrot.lane.b32.xlu0 %v3326_v35, %s3536_s26 }
0x1ddf   :  { %v3328_v8 = vpop.eup %3327 }
0x1de0   :  { %1827 = vrot.lane.b32.xlu1 %v3328_v8, %s3536_s26 }
0x1e50   :  { %v1826_v36 = vpop.permute.xlu0 %1825 }
0x1e51   :  { %v3966_v38 = vmul.f32 %v3322_v48, %v1826_v36 }
0x1e52   :  { %v1828_v37 = vpop.permute.xlu1 %1827 }
0x1e53   :  { %v3964_v12 = vmul.f32 %v3324_v22, %v1828_v37 }
0x1e55   :  { %v1845_v39 = vrot.slane %v3964_v12, 7 }
0x1e57   :  { %v1846_v40 = vsel %vm331_vm2, %v1845_v39, %v3966_v38 }
0x1e58   :  { %1847 = vrot.lane.b32.xlu1 %v1846_v40, %s3537_s3 }
0x1eca   :  { %v1848_v43 = vpop.permute.xlu1 %1847 }
0x1ecb   :  { %2968 = vmatmul.mubr.msk.f32.vlgmr.msra.gmra.mrb[12].mxu1 %vm189_vm3, %v1848_v43 }
0x1ecc   :  { %3117 = vmatpush3.bf16.msra.mxu1 %v3871_v62  ;;  %2989 = vmatprep.mubr.msk.f32.mxu1 %vm3534_vm0, %v3535_v1 }
0x1ecd   :  { %3118 = vmatprep.subr.bf16.mxu1 %v3533_v0 }
0x1ed0   :  { %3120 = vmatpush3.bf16.msra.mxu1 %v3876_v29 }
0x1ed1   :  { %3127 = vmatprep.subr.bf16.mxu1 %v3533_v0 }
0x1f9e   :  { %v1917_v45 = vpop.f32.mrb[12].mxu1 }
0x1f9f   :  { %v1922_v46 = vrot.slane %v1917_v45, 1  ;;  %v1925_v47 = vadd.f32 %v1917_v45, %v1843_v44  ;;  %v2969_v49 = vpop.f32.mrb[13].mxu1 }
0x1fa1   :  { %v1926_v52 = vadd.f32 %v1922_v46, %v1844_v50  ;;  %3329 = vtanh.f32 %v1925_v47  ;;  %v2707_v55 = vmul.f32 -1.442695, %v1925_v47 }
0x1fa3   :  { %3331 = vtanh.f32 %v1926_v52  ;;  %v2708_v56 = vmul.f32 -1.442695, %v1926_v52 }
0x1fa4   :  { %3333 = vpow2.f32 %v2707_v55 }
0x1fa5   :  { %3335 = vpow2.f32 %v2708_v56 }
0x1fab   :  { %v3330_v53 = vpop.eup %3329 }
0x1fac   :  { %1945 = vrot.lane.b32.xlu1 %v3330_v53, %s3536_s26 }
0x1fad   :  { %v3332_v54 = vpop.eup %3331 }
0x1fae   :  { %1947 = vrot.lane.b32.xlu0 %v3332_v54, %s3536_s26  ;;  %v3334_v57 = vpop.eup %3333 }
0x1faf   :  { %v3336_v58 = vpop.eup %3335  ;;  %v1933_v59 = vadd.f32 1.0, %v3334_v57 }
0x1fb0   :  { %v1934_v60 = vadd.f32 1.0, %v3336_v58 }
0x1fb1   :  { %3337 = vrcp.f32 %v1933_v59 }
0x1fb2   :  { %3339 = vrcp.f32 %v1934_v60 }
0x1fbb   :  { %v3338_v3 = vpop.eup %3337 }
0x1fbc   :  { %v3340_v9 = vpop.eup %3339  ;;  %v1941_v13 = vmul.f32 %v3338_v3, %v1819_v31 }
0x1fbd   :  { %v1942_v16 = vmul.f32 %v3340_v9, %v1820_v34 }
0x201e   :  { %v1946_v4 = vpop.permute.xlu1 %1945 }
0x201f   :  { %v1951_v7 = vmul.f32 %v3338_v3, %v1946_v4 }
0x2020   :  { %v1948_v10 = vpop.permute.xlu0 %1947 }
0x2021   :  { %1955 = vrot.lane.b32.xlu1 %v1951_v7, %s3537_s3  ;;  %v1952_v11 = vmul.f32 %v3340_v9, %v1948_v10 }
0x2023   :  { %1957 = vrot.lane.b32.xlu0 %v1952_v11, %s3537_s3 }
0x2093   :  { %v1956_v14 = vpop.permute.xlu1 %1955 }
0x2094   :  { %v1961_v15 = vadd.f32 %v1956_v14, %v1941_v13 }
0x2095   :  { %v1958_v17 = vpop.permute.xlu0 %1957 }
0x2096   :  { %3341 = vtanh.f32 %v1961_v15  ;;  %v1962_v18 = vadd.f32 %v1958_v17, %v1942_v16 }
0x2098   :  { %3343 = vtanh.f32 %v1962_v18 }
0x20a0   :  { %v3342_v19 = vpop.eup %3341 }
0x20a1   :  { %1967 = vrot.lane.b32.xlu1 %v3342_v19, %s3536_s26 }
0x20a2   :  { %v3344_v20 = vpop.eup %3343 }
0x20a3   :  { %1969 = vrot.lane.b32.xlu0 %v3344_v20, %s3536_s26 }
0x2113   :  { %v1968_v23 = vpop.permute.xlu1 %1967 }
0x2114   :  { %v3987_v25 = vmul.f32 %v3338_v3, %v1968_v23 }
0x2115   :  { %v1970_v24 = vpop.permute.xlu0 %1969 }
0x2116   :  { %v3985_v51 = vmul.f32 %v3340_v9, %v1970_v24  ;;  %v2127_v9 = vld [vmem:[#allocation2 + $0x5] sm:$0x1] }
0x2118   :  { %v1987_v26 = vrot.slane %v3985_v51, 7 }
0x211a   :  { %v1988_v2 = vsel %vm331_vm2, %v1987_v26, %v3987_v25 }
0x211b   :  { %1989 = vrot.lane.b32.xlu0 %v1988_v2, %s3537_s3 }
0x218d   :  { %v1990_v48 = vpop.permute.xlu0 %1989 }
0x218e   :  { %2979 = vmatmul.mubr.msk.f32.vlgmr.msra.gmra.mrb[14].mxu0 %vm189_vm3, %v1990_v48 }
0x218f   :  { %3123 = vmatpush3.bf16.msra.mxu0 %v3871_v62  ;;  %3000 = vmatprep.mubr.msk.f32.mxu0 %vm3534_vm0, %v3535_v1 }
0x2190   :  { %3124 = vmatprep.subr.bf16.mxu0 %v3533_v0 }
0x2193   :  { %3126 = vmatpush3.bf16.msra.mxu0 %v3876_v29 }
0x2261   :  { %v2059_v41 = vpop.f32.mrb[14].mxu0 }
0x2262   :  { %v2064_v22 = vrot.slane %v2059_v41, 1  ;;  %v2067_v21 = vadd.f32 %v2059_v41, %v1985_v42  ;;  %v2980_v27 = vpop.f32.mrb[15].mxu0 }
0x2264   :  { %v2068_v30 = vadd.f32 %v2064_v22, %v1986_v28  ;;  %3345 = vtanh.f32 %v2067_v21  ;;  %v2710_v33 = vmul.f32 -1.442695, %v2067_v21 }
0x2266   :  { %3347 = vtanh.f32 %v2068_v30  ;;  %v2711_v34 = vmul.f32 -1.442695, %v2068_v30 }
0x2267   :  { %3349 = vpow2.f32 %v2710_v33 }
0x2268   :  { %3351 = vpow2.f32 %v2711_v34 }
0x226e   :  { %v3346_v31 = vpop.eup %3345 }
0x226f   :  { %2087 = vrot.lane.b32.xlu0 %v3346_v31, %s3536_s26 }
0x2270   :  { %v3348_v32 = vpop.eup %3347 }
0x2271   :  { %2089 = vrot.lane.b32.xlu1 %v3348_v32, %s3536_s26  ;;  %v3350_v35 = vpop.eup %3349 }
0x2272   :  { %v3352_v8 = vpop.eup %3351  ;;  %v2075_v36 = vadd.f32 1.0, %v3350_v35 }
0x2273   :  { %v2076_v37 = vadd.f32 1.0, %v3352_v8 }
0x2274   :  { %3353 = vrcp.f32 %v2075_v36 }
0x2275   :  { %3355 = vrcp.f32 %v2076_v37 }
0x227e   :  { %v3354_v39 = vpop.eup %3353 }
0x227f   :  { %v3356_v44 = vpop.eup %3355  ;;  %v2083_v47 = vmul.f32 %v3354_v39, %v1961_v15  ;;  %v2128_v15 = vld [vmem:[#allocation2 + $0xd] sm:$0x1] }
0x2280   :  { %v2084_v52 = vmul.f32 %v3356_v44, %v1962_v18 }
0x22e1   :  { %v2088_v40 = vpop.permute.xlu0 %2087 }
0x22e2   :  { %v2093_v43 = vmul.f32 %v3354_v39, %v2088_v40  ;;  %v2269_v40 = vld [vmem:[#allocation2 + $0x6] sm:$0x1] }
0x22e3   :  { %v2090_v45 = vpop.permute.xlu1 %2089 }
0x22e4   :  { %2097 = vrot.lane.b32.xlu0 %v2093_v43, %s3537_s3  ;;  %v2094_v46 = vmul.f32 %v3356_v44, %v2090_v45 }
0x22e6   :  { %2099 = vrot.lane.b32.xlu1 %v2094_v46, %s3537_s3 }
0x2356   :  { %v2098_v49 = vpop.permute.xlu0 %2097 }
0x2357   :  { %v2103_v50 = vadd.f32 %v2098_v49, %v2083_v47  ;;  %v2270_v47 = vld [vmem:[#allocation2 + $0xe] sm:$0x1] }
0x2358   :  { %v2100_v53 = vpop.permute.xlu1 %2099 }
0x2359   :  { %3357 = vtanh.f32 %v2103_v50  ;;  %v2104_v54 = vadd.f32 %v2100_v53, %v2084_v52 }
0x235b   :  { %3359 = vtanh.f32 %v2104_v54 }
0x2363   :  { %v3358_v55 = vpop.eup %3357 }
0x2364   :  { %2109 = vrot.lane.b32.xlu0 %v3358_v55, %s3536_s26 }
0x2365   :  { %v3360_v56 = vpop.eup %3359 }
0x2366   :  { %2111 = vrot.lane.b32.xlu1 %v3360_v56, %s3536_s26 }
0x23d6   :  { %v2110_v57 = vpop.permute.xlu0 %2109 }
0x23d7   :  { %v4007_v60 = vmul.f32 %v3354_v39, %v2110_v57 }
0x23d8   :  { %v2112_v58 = vpop.permute.xlu1 %2111 }
0x23d9   :  { %v4005_v59 = vmul.f32 %v3356_v44, %v2112_v58 }
0x23db   :  { %v2129_v3 = vrot.slane %v4005_v59, 7 }
0x23dd   :  { %v2130_v4 = vsel %vm331_vm2, %v2129_v3, %v4007_v60 }
0x23de   :  { %2131 = vrot.lane.b32.xlu1 %v2130_v4, %s3537_s3 }
0x2450   :  { %v2132_v7 = vpop.permute.xlu1 %2131 }
0x2451   :  { %2990 = vmatmul.mubr.msk.f32.vlgmr.msra.gmra.mrb[14].mxu1 %vm189_vm3, %v2132_v7 }
0x2452   :  { %3129 = vmatpush3.bf16.msra.mxu1 %v3871_v62  ;;  %3011 = vmatprep.mubr.msk.f32.mxu1 %vm3534_vm0, %v3535_v1 }
0x2453   :  { %3130 = vmatprep.subr.bf16.mxu1 %v3533_v0 }
0x2456   :  { %3132 = vmatpush3.bf16.msra.mxu1 %v3876_v29 }
0x2524   :  { %v2201_v10 = vpop.f32.mrb[14].mxu1 }
0x2525   :  { %v2206_v11 = vrot.slane %v2201_v10, 1  ;;  %v2209_v13 = vadd.f32 %v2201_v10, %v2127_v9  ;;  %v2991_v14 = vpop.f32.mrb[15].mxu1 }
0x2527   :  { %v2210_v16 = vadd.f32 %v2206_v11, %v2128_v15  ;;  %3361 = vtanh.f32 %v2209_v13  ;;  %v2713_v1 = vmul.f32 -1.442695, %v2209_v13 }
0x2529   :  { %3363 = vtanh.f32 %v2210_v16  ;;  %v2714_v18 = vmul.f32 -1.442695, %v2210_v16 }
0x252a   :  { %3365 = vpow2.f32 %v2713_v1 }
0x252b   :  { %3367 = vpow2.f32 %v2714_v18 }
0x2531   :  { %v3362_v17 = vpop.eup %3361 }
0x2532   :  { %2229 = vrot.lane.b32.xlu1 %v3362_v17, %s3536_s26 }
0x2533   :  { %v3364_v62 = vpop.eup %3363 }
0x2534   :  { %2231 = vrot.lane.b32.xlu0 %v3364_v62, %s3536_s26  ;;  %v3366_v0 = vpop.eup %3365 }
0x2535   :  { %v3368_v29 = vpop.eup %3367  ;;  %v2217_v19 = vadd.f32 1.0, %v3366_v0 }
0x2536   :  { %v2218_v20 = vadd.f32 1.0, %v3368_v29 }
0x2537   :  { %3369 = vrcp.f32 %v2217_v19 }
0x2538   :  { %3371 = vrcp.f32 %v2218_v20 }
0x2541   :  { %v3370_v23 = vpop.eup %3369 }
0x2542   :  { %v3372_v2 = vpop.eup %3371  ;;  %v2225_v41 = vmul.f32 %v3370_v23, %v2103_v50 }
0x2543   :  { %v2226_v27 = vmul.f32 %v3372_v2, %v2104_v54 }
0x25a4   :  { %v2230_v24 = vpop.permute.xlu1 %2229 }
0x25a5   :  { %v2235_v26 = vmul.f32 %v3370_v23, %v2230_v24 }
0x25a6   :  { %v2232_v48 = vpop.permute.xlu0 %2231 }
0x25a7   :  { %2239 = vrot.lane.b32.xlu1 %v2235_v26, %s3537_s3  ;;  %v2236_v42 = vmul.f32 %v3372_v2, %v2232_v48 }
0x25a9   :  { %2241 = vrot.lane.b32.xlu0 %v2236_v42, %s3537_s3 }
0x2619   :  { %v2240_v22 = vpop.permute.xlu1 %2239 }
0x261a   :  { %v2245_v21 = vadd.f32 %v2240_v22, %v2225_v41 }
0x261b   :  { %v2242_v28 = vpop.permute.xlu0 %2241 }
0x261c   :  { %3373 = vtanh.f32 %v2245_v21  ;;  %v2246_v30 = vadd.f32 %v2242_v28, %v2226_v27 }
0x261e   :  { %3375 = vtanh.f32 %v2246_v30 }
0x2626   :  { %v3374_v31 = vpop.eup %3373 }
0x2627   :  { %2251 = vrot.lane.b32.xlu1 %v3374_v31, %s3536_s26 }
0x2628   :  { %v3376_v32 = vpop.eup %3375 }
0x2629   :  { %2253 = vrot.lane.b32.xlu0 %v3376_v32, %s3536_s26 }
0x2699   :  { %v2252_v33 = vpop.permute.xlu1 %2251 }
0x269a   :  { %v4027_v8 = vmul.f32 %v3370_v23, %v2252_v33 }
0x269b   :  { %v2254_v34 = vpop.permute.xlu0 %2253 }
0x269c   :  { %v4025_v35 = vmul.f32 %v3372_v2, %v2254_v34  ;;  %v2411_v2 = vld [vmem:[#allocation2 + $0x7] sm:$0x1] }
0x269e   :  { %v2271_v36 = vrot.slane %v4025_v35, 7 }
0x26a0   :  { %v2272_v37 = vsel %vm331_vm2, %v2271_v36, %v4027_v8 }
0x26a1   :  { %2273 = vrot.lane.b32.xlu0 %v2272_v37, %s3537_s3 }
0x2713   :  { %v2274_v39 = vpop.permute.xlu0 %2273 }
0x2714   :  { %3001 = vmatmul.mubr.msk.f32.vlgmr.msra.gmra.mrb[16].mxu0 %vm189_vm3, %v2274_v39 }
0x27e7   :  { %v2343_v43 = vpop.f32.mrb[16].mxu0 }
0x27e8   :  { %v2348_v44 = vrot.slane %v2343_v43, 1  ;;  %v2351_v45 = vadd.f32 %v2343_v43, %v2269_v40  ;;  %v3002_v46 = vpop.f32.mrb[17].mxu0 }
0x27ea   :  { %v2352_v49 = vadd.f32 %v2348_v44, %v2270_v47  ;;  %3377 = vtanh.f32 %v2351_v45  ;;  %v2716_v53 = vmul.f32 -1.442695, %v2351_v45 }
0x27ec   :  { %3379 = vtanh.f32 %v2352_v49  ;;  %v2717_v54 = vmul.f32 -1.442695, %v2352_v49 }
0x27ed   :  { %3381 = vpow2.f32 %v2716_v53 }
0x27ee   :  { %3383 = vpow2.f32 %v2717_v54 }
0x27f4   :  { %v3378_v50 = vpop.eup %3377 }
0x27f5   :  { %2371 = vrot.lane.b32.xlu0 %v3378_v50, %s3536_s26 }
0x27f6   :  { %v3380_v52 = vpop.eup %3379 }
0x27f7   :  { %2373 = vrot.lane.b32.xlu1 %v3380_v52, %s3536_s26  ;;  %v3382_v55 = vpop.eup %3381 }
0x27f8   :  { %v3384_v56 = vpop.eup %3383  ;;  %v2359_v57 = vadd.f32 1.0, %v3382_v55 }
0x27f9   :  { %v2360_v58 = vadd.f32 1.0, %v3384_v56 }
0x27fa   :  { %3385 = vrcp.f32 %v2359_v57 }
0x27fb   :  { %3387 = vrcp.f32 %v2360_v58 }
0x2804   :  { %v3386_v3 = vpop.eup %3385 }
0x2805   :  { %v3388_v9 = vpop.eup %3387  ;;  %v2367_v13 = vmul.f32 %v3386_v3, %v2245_v21  ;;  %v2412_v21 = vld [vmem:[#allocation2 + $0xf] sm:$0x1] }
0x2806   :  { %v2368_v16 = vmul.f32 %v3388_v9, %v2246_v30 }
0x2867   :  { %v2372_v4 = vpop.permute.xlu0 %2371 }
0x2868   :  { %v2377_v7 = vmul.f32 %v3386_v3, %v2372_v4 }
0x2869   :  { %v2374_v10 = vpop.permute.xlu1 %2373 }
0x286a   :  { %2381 = vrot.lane.b32.xlu0 %v2377_v7, %s3537_s3  ;;  %v2378_v11 = vmul.f32 %v3388_v9, %v2374_v10 }
0x286c   :  { %2383 = vrot.lane.b32.xlu1 %v2378_v11, %s3537_s3 }
0x28dc   :  { %v2382_v14 = vpop.permute.xlu0 %2381 }
0x28dd   :  { %v2387_v15 = vadd.f32 %v2382_v14, %v2367_v13 }
0x28de   :  { %v2384_v17 = vpop.permute.xlu1 %2383 }
0x28df   :  { %3389 = vtanh.f32 %v2387_v15  ;;  %v2388_v62 = vadd.f32 %v2384_v17, %v2368_v16 }
0x28e1   :  { %3391 = vtanh.f32 %v2388_v62 }
0x28e9   :  { %v3390_v1 = vpop.eup %3389 }
0x28ea   :  { %2393 = vrot.lane.b32.xlu0 %v3390_v1, %s3536_s26 }
0x28eb   :  { %v3392_v18 = vpop.eup %3391 }
0x28ec   :  { %2395 = vrot.lane.b32.xlu1 %v3392_v18, %s3536_s26 }
0x295c   :  { %v2394_v0 = vpop.permute.xlu0 %2393 }
0x295d   :  { %v2399_v20 = vmul.f32 %v3386_v3, %v2394_v0  ;;  %v2721_v0 = vld [vmem:[%s4133_s8] ss:$0 sm:$0xff] }
0x295e   :  { %v2396_v29 = vpop.permute.xlu1 %2395 }
0x295f   :  { %v2400_v19 = vmul.f32 %v3388_v9, %v2396_v29 }
0x2961   :  { %v2413_v23 = vrot.slane %v2400_v19, 7 }
0x2963   :  { %v2414_v24 = vsel %vm331_vm2, %v2413_v23, %v2399_v20 }
0x2964   :  { %2415 = vrot.lane.b32.xlu1 %v2414_v24, %s3537_s3 }
0x29d6   :  { %v2416_v26 = vpop.permute.xlu1 %2415 }
0x29d7   :  { %3012 = vmatmul.mubr.msk.f32.vlgmr.msra.gmra.mrb[16].mxu1 %vm189_vm3, %v2416_v26 }
0x2aaa   :  { %v2485_v48 = vpop.f32.mrb[16].mxu1 }
0x2aab   :  { %v2490_v42 = vrot.slane %v2485_v48, 1  ;;  %v2493_v41 = vadd.f32 %v2485_v48, %v2411_v2  ;;  %v3013_v22 = vpop.f32.mrb[17].mxu1 }
0x2aad   :  { %v2494_v27 = vadd.f32 %v2490_v42, %v2412_v21  ;;  %3393 = vtanh.f32 %v2493_v41  ;;  %v2719_v31 = vmul.f32 -1.442695, %v2493_v41 }
0x2aaf   :  { %3395 = vtanh.f32 %v2494_v27  ;;  %v2720_v32 = vmul.f32 -1.442695, %v2494_v27 }
0x2ab0   :  { %3397 = vpow2.f32 %v2719_v31 }
0x2ab1   :  { %3399 = vpow2.f32 %v2720_v32 }
0x2ab7   :  { %v3394_v28 = vpop.eup %3393 }
0x2ab8   :  { %2513 = vrot.lane.b32.xlu0 %v3394_v28, %s3536_s26 }
0x2ab9   :  { %v3396_v30 = vpop.eup %3395 }
0x2aba   :  { %2515 = vrot.lane.b32.xlu1 %v3396_v30, %s3536_s26  ;;  %v3398_v33 = vpop.eup %3397 }
0x2abb   :  { %v3400_v34 = vpop.eup %3399  ;;  %v2501_v36 = vadd.f32 1.0, %v3398_v33 }
0x2abc   :  { %v2502_v37 = vadd.f32 1.0, %v3400_v34 }
0x2abd   :  { %3401 = vrcp.f32 %v2501_v36 }
0x2abe   :  { %3403 = vrcp.f32 %v2502_v37 }
0x2ac7   :  { %v3402_v39 = vpop.eup %3401 }
0x2ac8   :  { %v3404_v44 = vpop.eup %3403  ;;  %v2509_v47 = vmul.f32 %v3402_v39, %v2387_v15 }
0x2ac9   :  { %v2510_v52 = vmul.f32 %v3404_v44, %v2388_v62 }
0x2b2a   :  { %v2514_v40 = vpop.permute.xlu0 %2513 }
0x2b2b   :  { %v2519_v43 = vmul.f32 %v3402_v39, %v2514_v40 }
0x2b2c   :  { %v2516_v45 = vpop.permute.xlu1 %2515 }
0x2b2d   :  { %2523 = vrot.lane.b32.xlu0 %v2519_v43, %s3537_s3  ;;  %v2520_v46 = vmul.f32 %v3404_v44, %v2516_v45 }
0x2b2f   :  { %2525 = vrot.lane.b32.xlu1 %v2520_v46, %s3537_s3 }
0x2b9f   :  { %v2524_v49 = vpop.permute.xlu0 %2523 }
0x2ba0   :  { %v2529_v50 = vadd.f32 %v2524_v49, %v2509_v47 }
0x2ba1   :  { %v2526_v53 = vpop.permute.xlu1 %2525 }
0x2ba2   :  { %3405 = vtanh.f32 %v2529_v50  ;;  %v2530_v54 = vadd.f32 %v2526_v53, %v2510_v52 }
0x2ba4   :  { %3407 = vtanh.f32 %v2530_v54 }
0x2bac   :  { %v3406_v55 = vpop.eup %3405 }
0x2bad   :  { %2535 = vrot.lane.b32.xlu0 %v3406_v55, %s3536_s26 }
0x2bae   :  { %v3408_v56 = vpop.eup %3407 }
0x2baf   :  { %2537 = vrot.lane.b32.xlu1 %v3408_v56, %s3536_s26 }
0x2bb1   :  { %1551 = vrot.lane.b32.xlu0 %v3924_v61, %s3537_s3  ;;  %v2555_v61 = vld [vmem:[%s4132_s7] sm:$0xff] }
0x2bb3   :  { %1693 = vrot.lane.b32.xlu1 %v3945_v6, %s3537_s3  ;;  %v2557_v6 = vld [vmem:[%s4132_s7 + $0x10] sm:$0xff] }
0x2bb5   :  { %1835 = vrot.lane.b32.xlu0 %v3966_v38, %s3537_s3 }
0x2bb7   :  { %1977 = vrot.lane.b32.xlu1 %v3987_v25, %s3537_s3 }
0x2bb9   :  { %2119 = vrot.lane.b32.xlu0 %v4007_v60, %s3537_s3 }
0x2bbb   :  { %2261 = vrot.lane.b32.xlu1 %v4027_v8, %s3537_s3 }
0x2bbd   :  { %2403 = vrot.lane.b32.xlu0 %v2399_v20, %s3537_s3 }
0x2bbf   :  { %1695 = vrot.lane.b32.xlu1 %v3943_v5, %s3537_s3 }
0x2bc1   :  { %1553 = vrot.lane.b32.xlu0 %v3922_v63, %s3537_s3  ;;  %v2556_v63 = vld [vmem:[%s4132_s7 + $0x8] sm:$0xff] }
0x2bc2   :  { %v3133_v5 = vpack.c.bf16 %v2556_v63, %v2555_v61 }
0x2bc3   :  { %1979 = vrot.lane.b32.xlu1 %v3985_v51, %s3537_s3 }
0x2bc4   :  { %3134 = vmatprep.subr.bf16.mxu0 %v3133_v5 }
0x2bc5   :  { %1837 = vrot.lane.b32.xlu0 %v3964_v12, %s3537_s3  ;;  %v2558_v12 = vld [vmem:[%s4132_s7 + $0x18] sm:$0xff]  ;;  %3136 = vmatpush3.bf16.msra.mxu0 %v3133_v5 }
0x2bc6   :  { %v3137_v38 = vpack.c.bf16 %v2558_v12, %v2557_v6 }
0x2bc7   :  { %2263 = vrot.lane.b32.xlu1 %v4025_v35, %s3537_s3 }
0x2bc8   :  { %3138 = vmatprep.subr.bf16.mxu0 %v3137_v38 }
0x2bc9   :  { %2121 = vrot.lane.b32.xlu0 %v4005_v59, %s3537_s3  ;;  %3140 = vmatpush3.bf16.msra.mxu0 %v3137_v38 }
0x2bcd   :  { %2405 = vrot.lane.b32.xlu0 %v2400_v19, %s3537_s3 }
0x2c1f   :  { %v2536_v51 = vpop.permute.xlu0 %2535 }
0x2c20   :  { %v2541_v25 = vmul.f32 %v3402_v39, %v2536_v51 }
0x2c21   :  { %v2538_v59 = vpop.permute.xlu1 %2537 }
0x2c22   :  { %2545 = vrot.lane.b32.xlu1 %v2541_v25, %s3537_s3  ;;  %v2542_v35 = vmul.f32 %v3404_v44, %v2538_v59 }
0x2c23   :  { %v1552_v60 = vpop.permute.xlu0 %1551 }
0x2c24   :  { %1557 = vst.msk [vmem:[#allocation3] sm:$0x1] %vm325_vm4, %v1552_v60 }
0x2c25   :  { %v1694_v8 = vpop.permute.xlu1 %1693 }
0x2c26   :  { %2547 = vrot.lane.b32.xlu1 %v2542_v35, %s3537_s3  ;;  %1699 = vst.msk [vmem:[#allocation3 + $0x1] sm:$0x1] %vm325_vm4, %v1694_v8 }
0x2c27   :  { %v1836_v57 = vpop.permute.xlu0 %1835 }
0x2c28   :  { %1841 = vst.msk [vmem:[#allocation3 + $0x2] sm:$0x1] %vm325_vm4, %v1836_v57 }
0x2c29   :  { %v1978_v58 = vpop.permute.xlu1 %1977 }
0x2c2a   :  { %1983 = vst.msk [vmem:[#allocation3 + $0x3] sm:$0x1] %vm325_vm4, %v1978_v58 }
0x2c2b   :  { %v2120_v3 = vpop.permute.xlu0 %2119 }
0x2c2c   :  { %2125 = vst.msk [vmem:[#allocation3 + $0x4] sm:$0x1] %vm325_vm4, %v2120_v3 }
0x2c2d   :  { %v2262_v4 = vpop.permute.xlu1 %2261 }
0x2c2e   :  { %2267 = vst.msk [vmem:[#allocation3 + $0x5] sm:$0x1] %vm325_vm4, %v2262_v4 }
0x2c2f   :  { %v2404_v7 = vpop.permute.xlu0 %2403 }
0x2c30   :  { %2409 = vst.msk [vmem:[#allocation3 + $0x6] sm:$0x1] %vm325_vm4, %v2404_v7 }
0x2c31   :  { %v1696_v9 = vpop.permute.xlu1 %1695 }
0x2c32   :  { %1700 = vst.msk [vmem:[#allocation3 + $0x9] sm:$0x1] %vm325_vm4, %v1696_v9 }
0x2c33   :  { %v1554_v10 = vpop.permute.xlu0 %1553 }
0x2c34   :  { %1558 = vst.msk [vmem:[#allocation3 + $0x8] sm:$0x1] %vm325_vm4, %v1554_v10 }
0x2c35   :  { %v1980_v11 = vpop.permute.xlu1 %1979 }
0x2c36   :  { %1984 = vst.msk [vmem:[#allocation3 + $0xb] sm:$0x1] %vm325_vm4, %v1980_v11 }
0x2c37   :  { %v1838_v13 = vpop.permute.xlu0 %1837 }
0x2c38   :  { %1842 = vst.msk [vmem:[#allocation3 + $0xa] sm:$0x1] %vm325_vm4, %v1838_v13 }
0x2c39   :  { %v2264_v14 = vpop.permute.xlu1 %2263 }
0x2c3a   :  { %2268 = vst.msk [vmem:[#allocation3 + $0xd] sm:$0x1] %vm325_vm4, %v2264_v14 }
0x2c3b   :  { %v2122_v15 = vpop.permute.xlu0 %2121 }
0x2c3c   :  { %2126 = vst.msk [vmem:[#allocation3 + $0xc] sm:$0x1] %vm325_vm4, %v2122_v15 }
0x2c3f   :  { %v2406_v16 = vpop.permute.xlu0 %2405 }
0x2c40   :  { %2410 = vst.msk [vmem:[#allocation3 + $0xe] sm:$0x1] %vm325_vm4, %v2406_v16 }
0x2c94   :  { %v2546_v17 = vpop.permute.xlu1 %2545 }
0x2c95   :  { %2551 = vst.msk [vmem:[#allocation3 + $0x7] sm:$0x1] %vm325_vm4, %v2546_v17 }
0x2c98   :  { %v2548_v62 = vpop.permute.xlu1 %2547 }
0x2c99   :  { %2552 = vst.msk [vmem:[#allocation3 + $0xf] sm:$0x1] %vm325_vm4, %v2548_v62 }
0x2c9c   :  { %v2553_v1 = vld [vmem:[#allocation3] sm:$0xff] }
0x2c9d   :  { %3022 = vmatprep.mubr.msk.f32.mxu0 %vm189_vm3, %v2553_v1 }
0x2ca0   :  { %v2554_v18 = vld [vmem:[#allocation3 + $0x8] sm:$0xff] }
0x2ca1   :  { %3023 = vmatmul.mubr.msk.f32.vlgmr.msra.gmra.mrb[18].mxu0 %vm189_vm3, %v2554_v18 }
0x2d74   :  { %v3024_v29 = vpop.f32.mrb[18].mxu0 }
0x2d75   :  { %v2644_v19 = vadd.f32 %v3024_v29, %v2721_v0  ;;  %v2638_v20 = vpop.f32.mrb[19].mxu0 }
0x2d76   :  { %v2639_v23 = vadd.f32 %v2721_v0, %v2638_v20 }
0x2d77   :  { %2649 = vst.msk [vmem:[#allocation12 + $0x8] sm:$0xff] %vm2647_vm5, %v2644_v19 }
0x2d78   :  { %2648 = vst.msk [vmem:[#allocation12] sm:$0xff] %vm2647_vm5, %v2639_v23 }
0x2d79   :  { %3508 = shalt.err (!%p3505_p8)
}
0x2d7a   :  { %s3509_s8 = scalar_lea.hbm %s4134_s9, 256 }
0x2d7b   :  { %p3510_p9 = scmp.ne.s32.totalorder %s4134_s9, %s3509_s8  ;;  %p3513_p10 = scmp.lt.u32.totalorder %s3509_s8, %s4134_s9 }
0x2d7d   :  { %p3515_p11 = pnand %p3513_p10, %p3510_p9 }
0x2d7f   :  { %3518 = shalt.err (!%p3515_p11)
}
0x2d80   :  { %2661 = dma.vmem_to_hbm [thread:$0]  %s2656_s4, 256, %s4134_s9, [#allocation6], %s3529_s21, %s3529_s21, %s3530_s22  }
0x2d81   :  { %3525 = dma.done.wait [#allocation6], 256  }
0x2d82   :  { %3526 = vsyncadd [#allocation6], 4294967040 }
0x2d83   :  { %2665 = vsyncpa [#allocation5], 1 }
0x2d84   :  { %2666 = vsyncpa [#allocation8], 1 }
0x2d85   :  { %2667 = vsyncpa [#allocation11], 1 }
0x2d86   :  { %2668 = vsyncpa [#allocation6], 1 }

</bundles_post_ra>
